<compile_context>
chip_gen: v6e
topology: v6e:2x2x1
jax: 0.10.0
libtpu: 0.0.40
codegen_flags: <defaults>
</compile_context>

<pallas_src>
import functools

import jax
import jax.numpy as jnp
from jax import lax
from jax.experimental import pallas as pl
from jax.experimental.pallas import tpu as pltpu


# ---------------------------------------------------------------------------
# Fused kernel: expand (1x1) -> depthwise (3x3, stride s) -> project (1x1) + residual
# ---------------------------------------------------------------------------
def _fused_kernel(*refs, stride, has_expand, use_res):
    if has_expand:
        (x_ref, w_e_ref, s_e_ref, b_e_ref,
         w_dw_ref, s_dw_ref, b_dw_ref,
         w_p_ref, s_p_ref, b_p_ref,
         o_ref, hid_ref) = refs
    else:
        (x_ref,
         w_dw_ref, s_dw_ref, b_dw_ref,
         w_p_ref, s_p_ref, b_p_ref,
         o_ref, hid_ref) = refs
        w_e_ref = s_e_ref = b_e_ref = None

    th_out = o_ref.shape[1]                 # output rows per tile
    w_out = o_ref.shape[2]
    oup = o_ref.shape[3]
    w_in = x_ref.shape[2]
    h_in = x_ref.shape[1] - 2               # wrapper padded H by 1 on each side
    hid_c = hid_ref.shape[-1]
    n_rows = hid_ref.shape[0]               # stride*(th_out-1) + 3

    r = pl.program_id(1)
    r0 = r * th_out                         # output-row offset of this tile

    # ---------------- stage 1: expand 1x1 conv + BN + ReLU -> VMEM scratch ----------------
    # Scratch column layout: [0..6] slack, 7 = left zero pad, 8..W+7 = data, W+8 = right pad.
    hid_ref[...] = jnp.zeros((n_rows, w_in + 9, hid_c), jnp.float32)

    if stride == 1:
        # one contiguous slab of padded input rows [r0, r0 + th_out + 2)
        chunks = ((r0, 0, th_out + 2),)
    else:
        # wrapper parity-permuted the rows: [even padded rows | odd padded rows]
        chunks = ((r0, 0, th_out + 1),                       # even padded rows
                  (h_in // 2 + 1 + r0, th_out + 1, th_out))  # odd padded rows

    for src_off, dst_off, nrows in chunks:
        xs = x_ref[0, pl.ds(src_off, nrows), :, :]           # (nrows, W, Cin) bf16
        if has_expand:
            xm = xs.reshape(nrows * w_in, xs.shape[-1])
            hm = jnp.dot(xm, w_e_ref[...], preferred_element_type=jnp.float32)
            hm = jnp.maximum(hm * s_e_ref[...] + b_e_ref[...], 0.0)
            hs = hm.reshape(nrows, w_in, hid_c)
        else:
            hs = xs.astype(jnp.float32)
        hid_ref[pl.ds(dst_off, nrows), pl.ds(8, w_in), :] = hs   # aligned column offset 8

    # top / bottom halo rows that correspond to conv zero padding must be zero
    @pl.when(r == 0)
    def _zero_top():
        hid_ref[0:1, :, :] = jnp.zeros((1, w_in + 9, hid_c), jnp.float32)

    if stride == 1:
        @pl.when(r == pl.num_programs(1) - 1)
        def _zero_bottom():
            hid_ref[n_rows - 1:n_rows, :, :] = jnp.zeros((1, w_in + 9, hid_c), jnp.float32)

    # ---------------- stage 2: depthwise 3x3 + BN + ReLU (stride folded into slices) ------
    if stride == 1:
        row_starts = (0, 1, 2)
        col_starts = (7, 8, 9)
    else:
        row_starts = (0, th_out + 1, 1)          # even rows | odd rows | even rows shifted
        col_starts = (7, w_in // 2 + 8, 8)       # even cols | odd cols | even cols shifted

    wdw = w_dw_ref[...]                          # (3, 3, hid) f32
    acc = jnp.zeros((th_out, w_out, hid_c), jnp.float32)
    for kh in range(3):
        for kw in range(3):
            tap = hid_ref[pl.ds(row_starts[kh], th_out),
                          pl.ds(col_starts[kw], w_out), :]
            acc = acc + tap * wdw[kh, kw]
    z = jnp.maximum(acc * s_dw_ref[0] + b_dw_ref[0], 0.0)

    # ---------------- stage 3: project 1x1 conv + BN (+ residual) --------------------------
    zm = z.reshape(th_out * w_out, hid_c).astype(jnp.bfloat16)
    y = jnp.dot(zm, w_p_ref[...], preferred_element_type=jnp.float32)
    y = y * s_p_ref[...] + b_p_ref[...]
    if use_res:                                  # stride == 1 and cin == oup
        res = x_ref[0, pl.ds(r0 + 1, th_out), :, :]
        y = y + res.reshape(th_out * w_in, res.shape[-1]).astype(jnp.float32)
    o_ref[0] = y.reshape(th_out, w_out, oup).astype(o_ref.dtype)


def _row_tile(h_out, cap=8):
    """Largest divisor of h_out that is <= cap (output rows per grid step)."""
    best = 1
    for d in range(1, min(cap, h_out) + 1):
        if h_out % d == 0:
            best = d
    return best


# ---------------------------------------------------------------------------
# Public forward (NCHW in / NCHW out, like the PyTorch module)
# ---------------------------------------------------------------------------
def inverted_residual_forward(x_nchw, p, *, stride, expand_ratio):
    assert stride in (1, 2)
    n, cin, h, w = x_nchw.shape
    if stride == 2:
        assert h % 2 == 0 and w % 2 == 0, "stride-2 path assumes even H, W"
    has_expand = expand_ratio != 1
    hid = p["w_dw"].shape[-1]
    oup = p["w_proj"].shape[1]
    use_res = (stride == 1) and (cin == oup)

    x = jnp.transpose(x_nchw, (0, 2, 3, 1)).astype(jnp.bfloat16)     # NHWC, bf16
    xh = jnp.pad(x, ((0, 0), (1, 1), (0, 0), (0, 0)))                # 1-row halo (small input only)
    if stride == 2:
        # Parity-permute rows and columns of the (small) input so that stride-2 depthwise
        # taps become contiguous slices of the VMEM hidden scratch inside the kernel.
        xh = jnp.concatenate([xh[:, 0::2], xh[:, 1::2]], axis=1)        # even | odd padded rows
        xh = jnp.concatenate([xh[:, :, 1::2], xh[:, :, 0::2]], axis=2)  # odd | even original cols

    h_out, w_out = h // stride, w // stride
    th_out = _row_tile(h_out, 8)
    n_rows = stride * (th_out - 1) + 3
    hp = h + 2

    kern = functools.partial(_fused_kernel, stride=stride,
                             has_expand=has_expand, use_res=use_res)

    inputs = [xh]
    in_specs = [pl.BlockSpec((1, hp, w, cin), lambda b, r: (b, 0, 0, 0))]
    if has_expand:
        inputs += [p["w_expand"].astype(jnp.bfloat16),
                   p["s_expand"].reshape(1, hid),
                   p["b_expand"].reshape(1, hid)]
        in_specs += [pl.BlockSpec((cin, hid), lambda b, r: (0, 0)),
                     pl.BlockSpec((1, hid), lambda b, r: (0, 0)),
                     pl.BlockSpec((1, hid), lambda b, r: (0, 0))]
    inputs += [p["w_dw"],
               p["s_dw"].reshape(1, hid), p["b_dw"].reshape(1, hid),
               p["w_proj"].astype(jnp.bfloat16),
               p["s_proj"].reshape(1, oup), p["b_proj"].reshape(1, oup)]
    in_specs += [pl.BlockSpec((3, 3, hid), lambda b, r: (0, 0, 0)),
                 pl.BlockSpec((1, hid), lambda b, r: (0, 0)),
                 pl.BlockSpec((1, hid), lambda b, r: (0, 0)),
                 pl.BlockSpec((hid, oup), lambda b, r: (0, 0)),
                 pl.BlockSpec((1, oup), lambda b, r: (0, 0)),
                 pl.BlockSpec((1, oup), lambda b, r: (0, 0))]

    out_nhwc = pl.pallas_call(
        kern,
        out_shape=jax.ShapeDtypeStruct((n, h_out, w_out, oup), jnp.float32),
        grid=(n, h_out // th_out),
        in_specs=in_specs,
        out_specs=pl.BlockSpec((1, th_out, w_out, oup), lambda b, r: (b, r, 0, 0)),
        scratch_shapes=[pltpu.VMEM((n_rows, w + 9, hid), jnp.float32)],
        compiler_params=pltpu.CompilerParams(
            dimension_semantics=("parallel", "parallel")),
    )(*inputs)
    return jnp.transpose(out_nhwc, (0, 3, 1, 2))                     # -> NCHW


# ---------------------------------------------------------------------------
# Deterministic parameter init (shapes follow the PyTorch module's __init__)
# ---------------------------------------------------------------------------
def init_params(key, inp, oup, expand_ratio):
    hidden = int(inp * expand_ratio)
    eps = 1e-5
    keys = jax.random.split(key, 6)

    def bn_fold(k, c):
        k1, k2, k3, k4 = jax.random.split(k, 4)
        gamma = jax.random.uniform(k1, (c,), minval=0.5, maxval=1.5)
        beta = 0.1 * jax.random.normal(k2, (c,))
        mean = 0.1 * jax.random.normal(k3, (c,))
        var = jax.random.uniform(k4, (c,), minval=0.5, maxval=1.5)
        scale = gamma / jnp.sqrt(var + eps)
        shift = beta - mean * scale
        return scale.astype(jnp.float32), shift.astype(jnp.float32)

    p = {}
    if expand_ratio != 1:
        # PyTorch Conv2d weight (hidden, inp, 1, 1) -> matmul weight (inp, hidden)
        p["w_expand"] = 0.2 * jax.random.normal(keys[0], (inp, hidden), jnp.float32)
        p["s_expand"], p["b_expand"] = bn_fold(keys[1], hidden)
    # PyTorch depthwise weight (hidden, 1, 3, 3) -> (3, 3, hidden)
    p["w_dw"] = 0.2 * jax.random.normal(keys[2], (3, 3, hidden), jnp.float32)
    p["s_dw"], p["b_dw"] = bn_fold(keys[3], hidden)
    # PyTorch Conv2d weight (oup, hidden, 1, 1) -> (hidden, oup)
    p["w_proj"] = 0.2 * jax.random.normal(keys[4], (hidden, oup), jnp.float32)
    p["s_proj"], p["b_proj"] = bn_fold(keys[5], oup)
    return p


# ---------------------------------------------------------------------------
# Pure-JAX reference (lax convs) with matching precision (bf16 matmul inputs, f32 acc)
# ---------------------------------------------------------------------------
def reference_forward(x_nchw, p, *, stride, expand_ratio):
    x = jnp.transpose(x_nchw, (0, 2, 3, 1)).astype(jnp.bfloat16)
    dn = ("NHWC", "HWIO", "NHWC")
    cin = x.shape[-1]
    if expand_ratio != 1:
        we = p["w_expand"].astype(jnp.bfloat16).reshape(1, 1, cin, -1)
        y = lax.conv_general_dilated(x, we, (1, 1), "VALID", dimension_numbers=dn,
                                     preferred_element_type=jnp.float32)
        y = jnp.maximum(y * p["s_expand"] + p["b_expand"], 0.0)
    else:
        y = x.astype(jnp.float32)
    hid = y.shape[-1]
    wd = p["w_dw"].reshape(3, 3, 1, hid)
    y = lax.conv_general_dilated(y, wd, (stride, stride), ((1, 1), (1, 1)),
                                 dimension_numbers=dn, feature_group_count=hid,
                                 preferred_element_type=jnp.float32)
    y = jnp.maximum(y * p["s_dw"] + p["b_dw"], 0.0)
    wp = p["w_proj"].astype(jnp.bfloat16).reshape(1, 1, hid, -1)
    y = lax.conv_general_dilated(y.astype(jnp.bfloat16), wp, (1, 1), "VALID",
                                 dimension_numbers=dn,
                                 preferred_element_type=jnp.float32)
    y = y * p["s_proj"] + p["b_proj"]
    if stride == 1 and cin == y.shape[-1]:
        y = y + x.astype(jnp.float32)
    return jnp.transpose(y, (0, 3, 1, 2))


if __name__ == "__main__":
    import numpy as np

    key = jax.random.PRNGKey(0)

    configs = [
        # (N, inp, H, W, oup, stride, expand_ratio)
        (2, 8, 16, 16, 8, 1, 4),     # expansion + residual connection
        (2, 8, 16, 16, 16, 2, 4),    # expansion + stride 2 (direct strided depthwise)
        (1, 16, 16, 16, 16, 1, 1),   # expand_ratio == 1 branch (+ residual)
    ]
    for i, (N, inp, H, W, oup, stride, er) in enumerate(configs):
        kx, kp = jax.random.split(jax.random.fold_in(key, i))
        x = jax.random.normal(kx, (N, inp, H, W), jnp.float32)
        params = init_params(kp, inp, oup, er)

        out = jax.block_until_ready(
            inverted_residual_forward(x, params, stride=stride, expand_ratio=er))
        ref = reference_forward(x, params, stride=stride, expand_ratio=er)

        assert out.shape == (N, oup, H // stride, W // stride), out.shape
        np.testing.assert_allclose(np.asarray(out), np.asarray(ref),
                                   rtol=2e-3, atol=2e-3)

    print("KERNEL_OK")
</pallas_src>

<mosaic_0001>
module attributes {stable_mosaic.version = 11 : i64} {
  func.func @_fused_kernel(%arg0: i32, %arg1: i32, %arg2: memref<1x18x16x8xbf16, #tpu.memory_space<vmem>>, %arg3: memref<8x32xbf16, #tpu.memory_space<vmem>>, %arg4: memref<1x32xf32, #tpu.memory_space<vmem>>, %arg5: memref<1x32xf32, #tpu.memory_space<vmem>>, %arg6: memref<3x3x32xf32, #tpu.memory_space<vmem>>, %arg7: memref<1x32xf32, #tpu.memory_space<vmem>>, %arg8: memref<1x32xf32, #tpu.memory_space<vmem>>, %arg9: memref<32x8xbf16, #tpu.memory_space<vmem>>, %arg10: memref<1x8xf32, #tpu.memory_space<vmem>>, %arg11: memref<1x8xf32, #tpu.memory_space<vmem>>, %arg12: memref<1x8x16x8xf32, #tpu.memory_space<vmem>>, %arg13: memref<10x25x32xf32, #tpu.memory_space<vmem>>) attributes {dimension_semantics = [#tpu.dimension_semantics<parallel>, #tpu.dimension_semantics<parallel>], iteration_bounds = array<i64: 2, 2>, scalar_prefetch = 0 : i64, scratch_operands = 1 : i64, tpu.core_type = #tpu.core_type<tc>, window_params = [{transform_indices = @transform_0, window_bounds = array<i64: 1, 18, 16, 8>}, {pipeline_mode = #tpu.pipeline_mode<synchronous>, transform_indices = @transform_1, window_bounds = array<i64: 8, 32>}, {pipeline_mode = #tpu.pipeline_mode<synchronous>, transform_indices = @transform_2, window_bounds = array<i64: 1, 32>}, {pipeline_mode = #tpu.pipeline_mode<synchronous>, transform_indices = @transform_3, window_bounds = array<i64: 1, 32>}, {pipeline_mode = #tpu.pipeline_mode<synchronous>, transform_indices = @transform_4, window_bounds = array<i64: 3, 3, 32>}, {pipeline_mode = #tpu.pipeline_mode<synchronous>, transform_indices = @transform_5, window_bounds = array<i64: 1, 32>}, {pipeline_mode = #tpu.pipeline_mode<synchronous>, transform_indices = @transform_6, window_bounds = array<i64: 1, 32>}, {pipeline_mode = #tpu.pipeline_mode<synchronous>, transform_indices = @transform_7, window_bounds = array<i64: 32, 8>}, {pipeline_mode = #tpu.pipeline_mode<synchronous>, transform_indices = @transform_8, window_bounds = array<i64: 1, 8>}, {pipeline_mode = #tpu.pipeline_mode<synchronous>, transform_indices = @transform_9, window_bounds = array<i64: 1, 8>}, {transform_indices = @transform_10, window_bounds = array<i64: 1, 8, 16, 8>}]} {
    %c8_i32 = arith.constant 8 : i32
    %0 = arith.muli %arg1, %c8_i32 : i32
    %cst = arith.constant 0.000000e+00 : f32
    %1 = vector.broadcast %cst : f32 to vector<10x25x32xf32>
    %c0 = arith.constant 0 : index
    %c0_0 = arith.constant 0 : index
    %c0_1 = arith.constant 0 : index
    %2 = vector.load %arg13[%c0, %c0_0, %c0_1] : memref<10x25x32xf32, #tpu.memory_space<vmem>>, vector<10x25x32xf32>
    tpu.vector_store %arg13[%c0, %c0_0, %c0_1], %1 {strides = array<i32>} : memref<10x25x32xf32, #tpu.memory_space<vmem>>, vector<10x25x32xf32>,
    %c0_2 = arith.constant 0 : index
    %3 = arith.index_cast %0 : i32 to index
    %c0_3 = arith.constant 0 : index
    %c0_4 = arith.constant 0 : index
    %4 = vector.load %arg2[%c0_2, %3, %c0_3, %c0_4] : memref<1x18x16x8xbf16, #tpu.memory_space<vmem>>, vector<1x10x16x8xbf16>
    %5 = vector.shape_cast %4 : vector<1x10x16x8xbf16> to vector<10x16x8xbf16>
    %6 = vector.shape_cast %5 : vector<10x16x8xbf16> to vector<160x8xbf16>
    %c0_5 = arith.constant 0 : index
    %c0_6 = arith.constant 0 : index
    %7 = vector.load %arg3[%c0_5, %c0_6] : memref<8x32xbf16, #tpu.memory_space<vmem>>, vector<8x32xbf16>
    %cst_7 = arith.constant dense<0.000000e+00> : vector<160x32xf32>
    %8 = tpu.matmul %6, %7, %cst_7 {dimension_numbers = #tpu.dot_dimension_numbers<[1], [0], [0], [1], [0, 0, 1, 1], [], []>} : vector<160x8xbf16>, vector<8x32xbf16>, vector<160x32xf32> -> vector<160x32xf32>
    %c0_8 = arith.constant 0 : index
    %c0_9 = arith.constant 0 : index
    %9 = vector.load %arg4[%c0_8, %c0_9] : memref<1x32xf32, #tpu.memory_space<vmem>>, vector<1x32xf32>
    %10 = vector.broadcast %9 : vector<1x32xf32> to vector<160x32xf32>
    %11 = arith.mulf %8, %10 : vector<160x32xf32>
    %c0_10 = arith.constant 0 : index
    %c0_11 = arith.constant 0 : index
    %12 = vector.load %arg5[%c0_10, %c0_11] : memref<1x32xf32, #tpu.memory_space<vmem>>, vector<1x32xf32>
    %13 = vector.broadcast %12 : vector<1x32xf32> to vector<160x32xf32>
    %14 = arith.addf %11, %13 : vector<160x32xf32>
    %cst_12 = arith.constant 0.000000e+00 : f32
    %15 = vector.broadcast %cst_12 : f32 to vector<160x32xf32>
    %16 = arith.maximumf %14, %15 : vector<160x32xf32>
    %17 = vector.shape_cast %16 : vector<160x32xf32> to vector<10x16x32xf32>
    %c0_13 = arith.constant 0 : index
    %c8 = arith.constant 8 : index
    %c0_14 = arith.constant 0 : index
    %18 = vector.load %arg13[%c0_13, %c8, %c0_14] : memref<10x25x32xf32, #tpu.memory_space<vmem>>, vector<10x16x32xf32>
    tpu.vector_store %arg13[%c0_13, %c8, %c0_14], %17 {strides = array<i32>} : memref<10x25x32xf32, #tpu.memory_space<vmem>>, vector<10x16x32xf32>,
    %c0_i32 = arith.constant 0 : i32
    %19 = arith.cmpi eq, %arg1, %c0_i32 : i32
    %20 = arith.extui %19 : i1 to i32
    %c0_i32_15 = arith.constant 0 : i32
    %21 = arith.cmpi ne, %20, %c0_i32_15 : i32
    scf.if %21 {
      %cst_64 = arith.constant 0.000000e+00 : f32
      %123 = vector.broadcast %cst_64 : f32 to vector<1x25x32xf32>
      %c0_65 = arith.constant 0 : index
      %c0_66 = arith.constant 0 : index
      %c0_67 = arith.constant 0 : index
      %124 = vector.load %arg13[%c0_65, %c0_66, %c0_67] : memref<10x25x32xf32, #tpu.memory_space<vmem>>, vector<1x25x32xf32>
      tpu.vector_store %arg13[%c0_65, %c0_66, %c0_67], %123 {strides = array<i32>} : memref<10x25x32xf32, #tpu.memory_space<vmem>>, vector<1x25x32xf32>,
    } else {
    }
    %c1_i32 = arith.constant 1 : i32
    %22 = arith.cmpi eq, %arg1, %c1_i32 : i32
    %23 = arith.extui %22 : i1 to i32
    %c0_i32_16 = arith.constant 0 : i32
    %24 = arith.cmpi ne, %23, %c0_i32_16 : i32
    scf.if %24 {
      %cst_64 = arith.constant 0.000000e+00 : f32
      %123 = vector.broadcast %cst_64 : f32 to vector<1x25x32xf32>
      %c9_65 = arith.constant 9 : index
      %c0_66 = arith.constant 0 : index
      %c0_67 = arith.constant 0 : index
      %124 = vector.load %arg13[%c9_65, %c0_66, %c0_67] : memref<10x25x32xf32, #tpu.memory_space<vmem>>, vector<1x25x32xf32>
      tpu.vector_store %arg13[%c9_65, %c0_66, %c0_67], %123 {strides = array<i32>} : memref<10x25x32xf32, #tpu.memory_space<vmem>>, vector<1x25x32xf32>,
    } else {
    }
    %c0_17 = arith.constant 0 : index
    %c0_18 = arith.constant 0 : index
    %c0_19 = arith.constant 0 : index
    %25 = vector.load %arg6[%c0_17, %c0_18, %c0_19] : memref<3x3x32xf32, #tpu.memory_space<vmem>>, vector<3x3x32xf32>
    %cst_20 = arith.constant 0.000000e+00 : f32
    %26 = vector.broadcast %cst_20 : f32 to vector<8x16x32xf32>
    %c0_21 = arith.constant 0 : index
    %c7 = arith.constant 7 : index
    %c0_22 = arith.constant 0 : index
    %27 = vector.load %arg13[%c0_21, %c7, %c0_22] : memref<10x25x32xf32, #tpu.memory_space<vmem>>, vector<8x16x32xf32>
    %28 = vector.extract_strided_slice %25 {offsets = [0, 0, 0], sizes = [1, 1, 32], strides = [1, 1, 1]} : vector<3x3x32xf32> to vector<1x1x32xf32>
    %29 = vector.shape_cast %28 : vector<1x1x32xf32> to vector<32xf32>
    %30 = vector.shape_cast %29 : vector<32xf32> to vector<1x1x32xf32>
    %31 = vector.broadcast %30 : vector<1x1x32xf32> to vector<8x16x32xf32>
    %32 = arith.mulf %27, %31 : vector<8x16x32xf32>
    %33 = arith.addf %26, %32 : vector<8x16x32xf32>
    %c0_23 = arith.constant 0 : index
    %c8_24 = arith.constant 8 : index
    %c0_25 = arith.constant 0 : index
    %34 = vector.load %arg13[%c0_23, %c8_24, %c0_25] : memref<10x25x32xf32, #tpu.memory_space<vmem>>, vector<8x16x32xf32>
    %35 = vector.extract_strided_slice %25 {offsets = [0, 1, 0], sizes = [1, 1, 32], strides = [1, 1, 1]} : vector<3x3x32xf32> to vector<1x1x32xf32>
    %36 = vector.shape_cast %35 : vector<1x1x32xf32> to vector<32xf32>
    %37 = vector.shape_cast %36 : vector<32xf32> to vector<1x1x32xf32>
    %38 = vector.broadcast %37 : vector<1x1x32xf32> to vector<8x16x32xf32>
    %39 = arith.mulf %34, %38 : vector<8x16x32xf32>
    %40 = arith.addf %33, %39 : vector<8x16x32xf32>
    %c0_26 = arith.constant 0 : index
    %c9 = arith.constant 9 : index
    %c0_27 = arith.constant 0 : index
    %41 = vector.load %arg13[%c0_26, %c9, %c0_27] : memref<10x25x32xf32, #tpu.memory_space<vmem>>, vector<8x16x32xf32>
    %42 = vector.extract_strided_slice %25 {offsets = [0, 2, 0], sizes = [1, 1, 32], strides = [1, 1, 1]} : vector<3x3x32xf32> to vector<1x1x32xf32>
    %43 = vector.shape_cast %42 : vector<1x1x32xf32> to vector<32xf32>
    %44 = vector.shape_cast %43 : vector<32xf32> to vector<1x1x32xf32>
    %45 = vector.broadcast %44 : vector<1x1x32xf32> to vector<8x16x32xf32>
    %46 = arith.mulf %41, %45 : vector<8x16x32xf32>
    %47 = arith.addf %40, %46 : vector<8x16x32xf32>
    %c1 = arith.constant 1 : index
    %c7_28 = arith.constant 7 : index
    %c0_29 = arith.constant 0 : index
    %48 = vector.load %arg13[%c1, %c7_28, %c0_29] : memref<10x25x32xf32, #tpu.memory_space<vmem>>, vector<8x16x32xf32>
    %49 = vector.extract_strided_slice %25 {offsets = [1, 0, 0], sizes = [1, 1, 32], strides = [1, 1, 1]} : vector<3x3x32xf32> to vector<1x1x32xf32>
    %50 = vector.shape_cast %49 : vector<1x1x32xf32> to vector<32xf32>
    %51 = vector.shape_cast %50 : vector<32xf32> to vector<1x1x32xf32>
    %52 = vector.broadcast %51 : vector<1x1x32xf32> to vector<8x16x32xf32>
    %53 = arith.mulf %48, %52 : vector<8x16x32xf32>
    %54 = arith.addf %47, %53 : vector<8x16x32xf32>
    %c1_30 = arith.constant 1 : index
    %c8_31 = arith.constant 8 : index
    %c0_32 = arith.constant 0 : index
    %55 = vector.load %arg13[%c1_30, %c8_31, %c0_32] : memref<10x25x32xf32, #tpu.memory_space<vmem>>, vector<8x16x32xf32>
    %56 = vector.extract_strided_slice %25 {offsets = [1, 1, 0], sizes = [1, 1, 32], strides = [1, 1, 1]} : vector<3x3x32xf32> to vector<1x1x32xf32>
    %57 = vector.shape_cast %56 : vector<1x1x32xf32> to vector<32xf32>
    %58 = vector.shape_cast %57 : vector<32xf32> to vector<1x1x32xf32>
    %59 = vector.broadcast %58 : vector<1x1x32xf32> to vector<8x16x32xf32>
    %60 = arith.mulf %55, %59 : vector<8x16x32xf32>
    %61 = arith.addf %54, %60 : vector<8x16x32xf32>
    %c1_33 = arith.constant 1 : index
    %c9_34 = arith.constant 9 : index
    %c0_35 = arith.constant 0 : index
    %62 = vector.load %arg13[%c1_33, %c9_34, %c0_35] : memref<10x25x32xf32, #tpu.memory_space<vmem>>, vector<8x16x32xf32>
    %63 = vector.extract_strided_slice %25 {offsets = [1, 2, 0], sizes = [1, 1, 32], strides = [1, 1, 1]} : vector<3x3x32xf32> to vector<1x1x32xf32>
    %64 = vector.shape_cast %63 : vector<1x1x32xf32> to vector<32xf32>
    %65 = vector.shape_cast %64 : vector<32xf32> to vector<1x1x32xf32>
    %66 = vector.broadcast %65 : vector<1x1x32xf32> to vector<8x16x32xf32>
    %67 = arith.mulf %62, %66 : vector<8x16x32xf32>
    %68 = arith.addf %61, %67 : vector<8x16x32xf32>
    %c2 = arith.constant 2 : index
    %c7_36 = arith.constant 7 : index
    %c0_37 = arith.constant 0 : index
    %69 = vector.load %arg13[%c2, %c7_36, %c0_37] : memref<10x25x32xf32, #tpu.memory_space<vmem>>, vector<8x16x32xf32>
    %70 = vector.extract_strided_slice %25 {offsets = [2, 0, 0], sizes = [1, 1, 32], strides = [1, 1, 1]} : vector<3x3x32xf32> to vector<1x1x32xf32>
    %71 = vector.shape_cast %70 : vector<1x1x32xf32> to vector<32xf32>
    %72 = vector.shape_cast %71 : vector<32xf32> to vector<1x1x32xf32>
    %73 = vector.broadcast %72 : vector<1x1x32xf32> to vector<8x16x32xf32>
    %74 = arith.mulf %69, %73 : vector<8x16x32xf32>
    %75 = arith.addf %68, %74 : vector<8x16x32xf32>
    %c2_38 = arith.constant 2 : index
    %c8_39 = arith.constant 8 : index
    %c0_40 = arith.constant 0 : index
    %76 = vector.load %arg13[%c2_38, %c8_39, %c0_40] : memref<10x25x32xf32, #tpu.memory_space<vmem>>, vector<8x16x32xf32>
    %77 = vector.extract_strided_slice %25 {offsets = [2, 1, 0], sizes = [1, 1, 32], strides = [1, 1, 1]} : vector<3x3x32xf32> to vector<1x1x32xf32>
    %78 = vector.shape_cast %77 : vector<1x1x32xf32> to vector<32xf32>
    %79 = vector.shape_cast %78 : vector<32xf32> to vector<1x1x32xf32>
    %80 = vector.broadcast %79 : vector<1x1x32xf32> to vector<8x16x32xf32>
    %81 = arith.mulf %76, %80 : vector<8x16x32xf32>
    %82 = arith.addf %75, %81 : vector<8x16x32xf32>
    %c2_41 = arith.constant 2 : index
    %c9_42 = arith.constant 9 : index
    %c0_43 = arith.constant 0 : index
    %83 = vector.load %arg13[%c2_41, %c9_42, %c0_43] : memref<10x25x32xf32, #tpu.memory_space<vmem>>, vector<8x16x32xf32>
    %84 = vector.extract_strided_slice %25 {offsets = [2, 2, 0], sizes = [1, 1, 32], strides = [1, 1, 1]} : vector<3x3x32xf32> to vector<1x1x32xf32>
    %85 = vector.shape_cast %84 : vector<1x1x32xf32> to vector<32xf32>
    %86 = vector.shape_cast %85 : vector<32xf32> to vector<1x1x32xf32>
    %87 = vector.broadcast %86 : vector<1x1x32xf32> to vector<8x16x32xf32>
    %88 = arith.mulf %83, %87 : vector<8x16x32xf32>
    %89 = arith.addf %82, %88 : vector<8x16x32xf32>
    %c0_44 = arith.constant 0 : index
    %c0_45 = arith.constant 0 : index
    %90 = vector.load %arg7[%c0_44, %c0_45] : memref<1x32xf32, #tpu.memory_space<vmem>>, vector<1x32xf32>
    %91 = vector.shape_cast %90 : vector<1x32xf32> to vector<32xf32>
    %92 = vector.shape_cast %91 : vector<32xf32> to vector<1x1x32xf32>
    %93 = vector.broadcast %92 : vector<1x1x32xf32> to vector<8x16x32xf32>
    %94 = arith.mulf %89, %93 : vector<8x16x32xf32>
    %c0_46 = arith.constant 0 : index
    %c0_47 = arith.constant 0 : index
    %95 = vector.load %arg8[%c0_46, %c0_47] : memref<1x32xf32, #tpu.memory_space<vmem>>, vector<1x32xf32>
    %96 = vector.shape_cast %95 : vector<1x32xf32> to vector<32xf32>
    %97 = vector.shape_cast %96 : vector<32xf32> to vector<1x1x32xf32>
    %98 = vector.broadcast %97 : vector<1x1x32xf32> to vector<8x16x32xf32>
    %99 = arith.addf %94, %98 : vector<8x16x32xf32>
    %cst_48 = arith.constant 0.000000e+00 : f32
    %100 = vector.broadcast %cst_48 : f32 to vector<8x16x32xf32>
    %101 = arith.maximumf %99, %100 : vector<8x16x32xf32>
    %102 = vector.shape_cast %101 : vector<8x16x32xf32> to vector<128x32xf32>
    %103 = arith.truncf %102 : vector<128x32xf32> to vector<128x32xbf16>
    %c0_49 = arith.constant 0 : index
    %c0_50 = arith.constant 0 : index
    %104 = vector.load %arg9[%c0_49, %c0_50] : memref<32x8xbf16, #tpu.memory_space<vmem>>, vector<32x8xbf16>
    %cst_51 = arith.constant dense<0.000000e+00> : vector<128x8xf32>
    %105 = tpu.matmul %103, %104, %cst_51 {dimension_numbers = #tpu.dot_dimension_numbers<[1], [0], [0], [1], [0, 0, 1, 1], [], []>} : vector<128x32xbf16>, vector<32x8xbf16>, vector<128x8xf32> -> vector<128x8xf32>
    %c0_52 = arith.constant 0 : index
    %c0_53 = arith.constant 0 : index
    %106 = vector.load %arg10[%c0_52, %c0_53] : memref<1x8xf32, #tpu.memory_space<vmem>>, vector<1x8xf32>
    %107 = vector.broadcast %106 : vector<1x8xf32> to vector<128x8xf32>
    %108 = arith.mulf %105, %107 : vector<128x8xf32>
    %c0_54 = arith.constant 0 : index
    %c0_55 = arith.constant 0 : index
    %109 = vector.load %arg11[%c0_54, %c0_55] : memref<1x8xf32, #tpu.memory_space<vmem>>, vector<1x8xf32>
    %110 = vector.broadcast %109 : vector<1x8xf32> to vector<128x8xf32>
    %111 = arith.addf %108, %110 : vector<128x8xf32>
    %c1_i32_56 = arith.constant 1 : i32
    %112 = arith.addi %0, %c1_i32_56 : i32
    %c0_57 = arith.constant 0 : index
    %113 = arith.index_cast %112 : i32 to index
    %c0_58 = arith.constant 0 : index
    %c0_59 = arith.constant 0 : index
    %114 = vector.load %arg2[%c0_57, %113, %c0_58, %c0_59] : memref<1x18x16x8xbf16, #tpu.memory_space<vmem>>, vector<1x8x16x8xbf16>
    %115 = vector.shape_cast %114 : vector<1x8x16x8xbf16> to vector<8x16x8xbf16>
    %116 = vector.shape_cast %115 : vector<8x16x8xbf16> to vector<128x8xbf16>
    %117 = arith.extf %116 : vector<128x8xbf16> to vector<128x8xf32>
    %118 = arith.addf %111, %117 : vector<128x8xf32>
    %119 = vector.shape_cast %118 : vector<128x8xf32> to vector<8x16x8xf32>
    %c0_60 = arith.constant 0 : index
    %c0_61 = arith.constant 0 : index
    %c0_62 = arith.constant 0 : index
    %c0_63 = arith.constant 0 : index
    %120 = vector.load %arg12[%c0_60, %c0_61, %c0_62, %c0_63] : memref<1x8x16x8xf32, #tpu.memory_space<vmem>>, vector<1x8x16x8xf32>
    %121 = vector.shape_cast %120 : vector<1x8x16x8xf32> to vector<8x16x8xf32>
    %122 = vector.shape_cast %119 : vector<8x16x8xf32> to vector<1x8x16x8xf32>
    tpu.vector_store %arg12[%c0_60, %c0_61, %c0_62, %c0_63], %122 {strides = array<i32>} : memref<1x8x16x8xf32, #tpu.memory_space<vmem>>, vector<1x8x16x8xf32>,
    return
  }
  func.func @transform_0(%arg0: i32, %arg1: i32) -> (i32, i32, i32, i32) {
    %c0_i32 = arith.constant 0 : i32
    %c0_i32_0 = arith.constant 0 : i32
    %c0_i32_1 = arith.constant 0 : i32
    %c0_i32_2 = arith.constant 0 : i32
    return %arg0, %c0_i32, %c0_i32_0, %c0_i32_1 : i32, i32, i32, i32
  }
  func.func @transform_1(%arg0: i32, %arg1: i32) -> (i32, i32) {
    %c0_i32 = arith.constant 0 : i32
    %c0_i32_0 = arith.constant 0 : i32
    %c0_i32_1 = arith.constant 0 : i32
    return %c0_i32, %c0_i32_0 : i32, i32
  }
  func.func @transform_2(%arg0: i32, %arg1: i32) -> (i32, i32) {
    %c0_i32 = arith.constant 0 : i32
    %c0_i32_0 = arith.constant 0 : i32
    %c0_i32_1 = arith.constant 0 : i32
    return %c0_i32, %c0_i32_0 : i32, i32
  }
  func.func @transform_3(%arg0: i32, %arg1: i32) -> (i32, i32) {
    %c0_i32 = arith.constant 0 : i32
    %c0_i32_0 = arith.constant 0 : i32
    %c0_i32_1 = arith.constant 0 : i32
    return %c0_i32, %c0_i32_0 : i32, i32
  }
  func.func @transform_4(%arg0: i32, %arg1: i32) -> (i32, i32, i32) {
    %c0_i32 = arith.constant 0 : i32
    %c0_i32_0 = arith.constant 0 : i32
    %c0_i32_1 = arith.constant 0 : i32
    %c0_i32_2 = arith.constant 0 : i32
    return %c0_i32, %c0_i32_0, %c0_i32_1 : i32, i32, i32
  }
  func.func @transform_5(%arg0: i32, %arg1: i32) -> (i32, i32) {
    %c0_i32 = arith.constant 0 : i32
    %c0_i32_0 = arith.constant 0 : i32
    %c0_i32_1 = arith.constant 0 : i32
    return %c0_i32, %c0_i32_0 : i32, i32
  }
  func.func @transform_6(%arg0: i32, %arg1: i32) -> (i32, i32) {
    %c0_i32 = arith.constant 0 : i32
    %c0_i32_0 = arith.constant 0 : i32
    %c0_i32_1 = arith.constant 0 : i32
    return %c0_i32, %c0_i32_0 : i32, i32
  }
  func.func @transform_7(%arg0: i32, %arg1: i32) -> (i32, i32) {
    %c0_i32 = arith.constant 0 : i32
    %c0_i32_0 = arith.constant 0 : i32
    %c0_i32_1 = arith.constant 0 : i32
    return %c0_i32, %c0_i32_0 : i32, i32
  }
  func.func @transform_8(%arg0: i32, %arg1: i32) -> (i32, i32) {
    %c0_i32 = arith.constant 0 : i32
    %c0_i32_0 = arith.constant 0 : i32
    %c0_i32_1 = arith.constant 0 : i32
    return %c0_i32, %c0_i32_0 : i32, i32
  }
  func.func @transform_9(%arg0: i32, %arg1: i32) -> (i32, i32) {
    %c0_i32 = arith.constant 0 : i32
    %c0_i32_0 = arith.constant 0 : i32
    %c0_i32_1 = arith.constant 0 : i32
    return %c0_i32, %c0_i32_0 : i32, i32
  }
  func.func @transform_10(%arg0: i32, %arg1: i32) -> (i32, i32, i32, i32) {
    %c0_i32 = arith.constant 0 : i32
    %c0_i32_0 = arith.constant 0 : i32
    %c0_i32_1 = arith.constant 0 : i32
    return %arg0, %arg1, %c0_i32, %c0_i32_0 : i32, i32, i32, i32
  }
}

</mosaic_0001>

<bundles_post_ra>
// kernel: tpu_custom_call.1
= control target key start
LH: loop header
LB: loop body
LE: loop exit
PB: predicated region body
PF: predicated region fallthrough
CT: control target
= control target key end

     0   :  { %s1984_s13 = smov 0   ;;  %s1986_s14 = smov 0   ;;  %s2636_s0 = inlined_call_operand.vmem [shape: bf16[2,18,16,8], index: 0, kind: input, shape index: {}]   ;;  %s2637_s1 = inlined_call_operand.vmem [shape: bf16[8,32], index: 1, kind: input, shape index: {}]   ;;  %s2638_s2 = inlined_call_operand.vmem [shape: f32[1,32], index: 2, kind: input, shape index: {}]   ;;  %s2639_s3 = inlined_call_operand.vmem [shape: f32[1,32], index: 3, kind: input, shape index: {}]   ;;  %s2640_s4 = inlined_call_operand.vmem [shape: f32[3,3,32], index: 4, kind: input, shape index: {}]   ;;  %s2641_s5 = inlined_call_operand.vmem [shape: f32[1,32], index: 5, kind: input, shape index: {}]   ;;  %s2642_s6 = inlined_call_operand.vmem [shape: f32[1,32], index: 6, kind: input, shape index: {}]   ;;  %s2643_s7 = inlined_call_operand.vmem [shape: bf16[32,8], index: 7, kind: input, shape index: {}]   ;;  %s2644_s8 = inlined_call_operand.vmem [shape: f32[1,8], index: 8, kind: input, shape index: {}]   ;;  %s2645_s9 = inlined_call_operand.vmem [shape: f32[1,8], index: 9, kind: input, shape index: {}]   ;;  %s2646_s10 = inlined_call_operand.vmem [shape: f32[2,16,16,8], index: 10, kind: output, shape index: {}]  }
   0x1   :  { %s1988_s15 = smov 0   ;;  %s1990_s16 = smov 0  }
   0x2   :  { %s1992_s17 = smov 0  }
   0x3 LB: > { %s29_s18 = sadd.s32 1, %s1916_s15  ;;  %s32_s19 = sadd.s32 1, %s1920_s16  ;;  %s1924_s17 = sphi %s1992_s17, %s20_s17   ;;  %s1920_s16 = sphi %s1990_s16, %s2651_s16   ;;  %s1916_s15 = sphi %s1988_s15, %s2650_s15   ;;  %s1912_s14 = sphi %s1986_s14, %s2649_s14   ;;  %s1908_s13 = sphi %s1984_s13, %s2648_s13  }
   0x4   : > { %p30_p0 = scmp.ge.s32.totalorder %s29_s18, 2  ;;  %p1656_p1 = scmp.ge.s32.totalorder %s1924_s17, 1 }
   0x5   : > { %p326_p2 = scmp.lt.s32.totalorder %s1924_s17, 5 }
   0x6   : > { %s2653_s18 = smov (%p30_p0, %s29_s18), 0  ;;  %s2655_s19 = smov (!%p30_p0, %s32_s19), %s1920_s16 }
   0x7   : > { %p327_p3 = pnand %p1656_p1, %p326_p2  ;;  %p34_p4 = scmp.ge.s32.totalorder %s2655_s19, 2 }
   0x8   : > { %p369_p5 = scmp.lt.s32.totalorder (!%p327_p3), %s1912_s14, 1  ;;  %s1658_s22 = sshll.u32 (!%p327_p3), %s1908_s13, 3 }
   0x9   : > { %s2657_s19 = smov (%p34_p4, %s2655_s19), 0  ;;  %330 = sbr.rel (%p327_p3) target bundleno = 582 (0x246), region = 60 }
   0xa   : > { %p2022_p6 = scmp.lt.s32.totalorder (!%p327_p3), %s1658_s22, 15  ;;  %s1724_s24 = sshll.u32 (!%p327_p3), %s1908_s13, 6 }
   0xb   : > { %p1687_p7 = scmp.ne.s32.totalorder (!%p327_p3), %s1908_s13, 0 }
   0xe   : > { %v452_v0 = vld [vmem:[%s2637_s1] sm:$0xf]  ;;  %vm534_vm0 = vcmask 1043456   ;;  %vm387_vm1 = vcmask 261120   ;;  %vm391_vm2 = vcmask 253952   ;;  %s2659_s14 = smov (!%p369_p5, %s1912_s14), 1 }
   0xf   : > { %1829 = vmatprep.subr.msk.bf16.mxu0 %vm534_vm0, %v452_v0  ;;  %v536_v1 = vsel %vm534_vm0, %v452_v0, 0  ;;  %v1926_v2 = vmov 0.0   ;;  %s2661_s22 = smov (!%p2022_p6, %s1658_s22), 15  ;;  %s1830_s25 = smul.u32 144, %s2659_s14  ;;  %vm503_vm3 = vcmask 64512  }
  0x10   : > { %1788 = vmatpush3.bf16.msra.mxu0 %v536_v1  ;;  %388 = vst.msk [vmem:[#allocation2] sm:$0xff] %vm387_vm1, %v1926_v2  ;;  %393 = vst.msk [vmem:[#allocation2 + $0x20] sm:$0xff] %vm387_vm1, %v1926_v2  ;;  %s1660_s26 = sshll.u32 %s2659_s14, 5  ;;  %s1659_s27 = sshll.u32 %s2661_s22, 1  ;;  %v2110_v13 = vld [vmem:[%s2638_s2] ss:$0 sm:$0xff] }
  0x11   : > { %392 = vst.msk [vmem:[#allocation2 + $0x18] sm:$0x1] %vm391_vm2, %v1926_v2  ;;  %396 = vst.msk [vmem:[#allocation2 + $0x38] sm:$0x1] %vm391_vm2, %v1926_v2  ;;  %s373_s30 = scalar_lea.vmem %s2636_s0, %s1830_s25  ;;  %s381_s11 = sadd.s32 %s1660_s26, %s1659_s27  ;;  %v2115_v15 = vld [vmem:[%s2639_s3] ss:$0 sm:$0xff] }
  0x12   : > { %394 = vst.msk [vmem:[#allocation2 + $0x28] sm:$0xff] %vm387_vm1, %v1926_v2  ;;  %397 = vst.msk [vmem:[#allocation2 + $0x40] sm:$0xff] %vm387_vm1, %v1926_v2  ;;  %s1661_s12 = sshll.u32 %s381_s11, 3  ;;  %s2080_s20 = scalar_lea.vmem %s373_s30, %s1724_s24 }
  0x13   : > { %400 = vst.msk [vmem:[#allocation2 + $0x58] sm:$0x1] %vm391_vm2, %v1926_v2  ;;  %404 = vst.msk [vmem:[#allocation2 + $0x78] sm:$0x1] %vm391_vm2, %v1926_v2  ;;  %s2085_s22 = scalar_lea.vmem %s2646_s10, %s1661_s12  ;;  %v1874_v3 = vld [vmem:[%s2080_s20] sm:$0xff]   ;;  %v1875_v4 = vld [vmem:[%s2080_s20 + $0x8] sm:$0xff]  }
  0x14   : > { %401 = vst.msk [vmem:[#allocation2 + $0x60] sm:$0xff] %vm387_vm1, %v1926_v2  ;;  %405 = vst.msk [vmem:[#allocation2 + $0x80] sm:$0xff] %vm387_vm1, %v1926_v2  ;;  %1789 = vmatprep.mubr.msk.bf16.mxu0 %vm503_vm3, %v1874_v3  ;;  %v1876_v5 = vld [vmem:[%s2080_s20 + $0x10] sm:$0xff]   ;;  %v1877_v6 = vld [vmem:[%s2080_s20 + $0x18] sm:$0xff]  }
  0x15   : > { %408 = vst.msk [vmem:[#allocation2 + $0x98] sm:$0x1] %vm391_vm2, %v1926_v2  ;;  %412 = vst.msk [vmem:[#allocation2 + $0xb8] sm:$0x1] %vm391_vm2, %v1926_v2  ;;  %1790 = vmatmul.mubr.msk.bf16.vlgmr.msra.gmra.mxu0 %vm503_vm3, %v1875_v4  ;;  %v1878_v7 = vld [vmem:[%s2080_s20 + $0x20] sm:$0xff]   ;;  %v1879_v8 = vld [vmem:[%s2080_s20 + $0x28] sm:$0xff]  }
  0x16   : > { %409 = vst.msk [vmem:[#allocation2 + $0xa0] sm:$0xff] %vm387_vm1, %v1926_v2  ;;  %413 = vst.msk [vmem:[#allocation2 + $0xc0] sm:$0xff] %vm387_vm1, %v1926_v2  ;;  %1793 = vmatprep.mubr.msk.bf16.mxu0 %vm503_vm3, %v1876_v5  ;;  %v1880_v9 = vld [vmem:[%s2080_s20 + $0x30] sm:$0xff]   ;;  %v1881_v10 = vld [vmem:[%s2080_s20 + $0x38] sm:$0xff]  }
  0x17   : > { %416 = vst.msk [vmem:[#allocation2 + $0xd8] sm:$0x1] %vm391_vm2, %v1926_v2  ;;  %420 = vst.msk [vmem:[#allocation2 + $0xf8] sm:$0x1] %vm391_vm2, %v1926_v2  ;;  %v1882_v11 = vld [vmem:[%s2080_s20 + $0x40] sm:$0xff]   ;;  %v1883_v12 = vld [vmem:[%s2080_s20 + $0x48] sm:$0xff]  }
  0x18   : > { %417 = vst.msk [vmem:[#allocation2 + $0xe0] sm:$0xff] %vm387_vm1, %v1926_v2  ;;  %421 = vst.msk [vmem:[#allocation2 + $0x100] sm:$0xff] %vm387_vm1, %v1926_v2 }
  0x19   : > { %424 = vst.msk [vmem:[#allocation2 + $0x118] sm:$0x1] %vm391_vm2, %v1926_v2  ;;  %428 = vst.msk [vmem:[#allocation2 + $0x138] sm:$0x1] %vm391_vm2, %v1926_v2 }
  0x1a   : > { %425 = vst.msk [vmem:[#allocation2 + $0x120] sm:$0xff] %vm387_vm1, %v1926_v2  ;;  %389 = vst.msk [vmem:[#allocation2 + $0x8] sm:$0xff] %vm387_vm1, %v1926_v2 }
  0x1b   : > { %390 = vst.msk [vmem:[#allocation2 + $0x10] sm:$0xff] %vm387_vm1, %v1926_v2  ;;  %395 = vst.msk [vmem:[#allocation2 + $0x30] sm:$0xff] %vm387_vm1, %v1926_v2 }
  0x1c   : > { %398 = vst.msk [vmem:[#allocation2 + $0x48] sm:$0xff] %vm387_vm1, %v1926_v2  ;;  %399 = vst.msk [vmem:[#allocation2 + $0x50] sm:$0xff] %vm387_vm1, %v1926_v2 }
  0x1d   : > { %402 = vst.msk [vmem:[#allocation2 + $0x68] sm:$0xff] %vm387_vm1, %v1926_v2  ;;  %403 = vst.msk [vmem:[#allocation2 + $0x70] sm:$0xff] %vm387_vm1, %v1926_v2  ;;  %1794 = vmatmul.mubr.msk.bf16.gmra.mxu0 %vm503_vm3, %v1877_v6 }
  0x1e   : > { %406 = vst.msk [vmem:[#allocation2 + $0x88] sm:$0xff] %vm387_vm1, %v1926_v2  ;;  %407 = vst.msk [vmem:[#allocation2 + $0x90] sm:$0xff] %vm387_vm1, %v1926_v2  ;;  %1797 = vmatprep.mubr.msk.bf16.mxu0 %vm503_vm3, %v1878_v7 }
  0x1f   : > { %410 = vst.msk [vmem:[#allocation2 + $0xa8] sm:$0xff] %vm387_vm1, %v1926_v2  ;;  %411 = vst.msk [vmem:[#allocation2 + $0xb0] sm:$0xff] %vm387_vm1, %v1926_v2 }
  0x20   : > { %414 = vst.msk [vmem:[#allocation2 + $0xc8] sm:$0xff] %vm387_vm1, %v1926_v2  ;;  %415 = vst.msk [vmem:[#allocation2 + $0xd0] sm:$0xff] %vm387_vm1, %v1926_v2 }
  0x21   : > { %418 = vst.msk [vmem:[#allocation2 + $0xe8] sm:$0xff] %vm387_vm1, %v1926_v2  ;;  %419 = vst.msk [vmem:[#allocation2 + $0xf0] sm:$0xff] %vm387_vm1, %v1926_v2 }
  0x22   : > { %422 = vst.msk [vmem:[#allocation2 + $0x108] sm:$0xff] %vm387_vm1, %v1926_v2  ;;  %423 = vst.msk [vmem:[#allocation2 + $0x110] sm:$0xff] %vm387_vm1, %v1926_v2 }
  0x23   : > { %426 = vst.msk [vmem:[#allocation2 + $0x128] sm:$0xff] %vm387_vm1, %v1926_v2  ;;  %427 = vst.msk [vmem:[#allocation2 + $0x130] sm:$0xff] %vm387_vm1, %v1926_v2 }
  0x25   : > { %1798 = vmatmul.mubr.msk.bf16.gmra.mxu0 %vm503_vm3, %v1879_v8 }
  0x26   : > { %1801 = vmatprep.mubr.msk.bf16.mxu0 %vm503_vm3, %v1880_v9 }
  0x2d   : > { %1802 = vmatmul.mubr.msk.bf16.gmra.mxu0 %vm503_vm3, %v1881_v10 }
  0x2e   : > { %1805 = vmatprep.mubr.msk.bf16.mxu0 %vm503_vm3, %v1882_v11 }
  0x35   : > { %1806 = vmatmul.mubr.msk.bf16.gmra.mxu0 %vm503_vm3, %v1883_v12 }
  0xd5   : > { %v1791_v14 = vpop.f32.mrf.mxu0 }
  0xd6   : > { %v660_v16 = vmul.f32 %v1791_v14, %v2110_v13 }
  0xd7   : > { %v572_v17 = vpop.f32.mrf.mxu0 }
  0xd8   : > { %v687_v18 = vadd.f32 %v2115_v15, %v660_v16  ;;  %v658_v19 = vmul.f32 %v2110_v13, %v572_v17 }
  0xd9   : > { %v1792_v20 = vpop.f32.mrf.mxu0 }
  0xda   : > { %v707_v21 = vmax.f32 %v687_v18, 0.0  ;;  %v685_v22 = vadd.f32 %v2115_v15, %v658_v19  ;;  %v661_v23 = vmul.f32 %v1792_v20, %v2110_v13 }
  0xdb   : > { %v575_v24 = vpop.f32.mrf.mxu0 }
  0xdc   : > { %727 = vst.msk [vmem:[#allocation2 + $0x28] sm:$0xff] %vm387_vm1, %v707_v21  ;;  %v705_v25 = vmax.f32 %v685_v22, 0.0  ;;  %v688_v26 = vadd.f32 %v2115_v15, %v661_v23  ;;  %v659_v27 = vmul.f32 %v2110_v13, %v575_v24 }
  0xdd   : > { %v1795_v28 = vpop.f32.mrf.mxu0 }
  0xde   : > { %725 = vst.msk [vmem:[#allocation2 + $0x8] sm:$0xff] %vm387_vm1, %v705_v25  ;;  %v708_v29 = vmax.f32 %v688_v26, 0.0  ;;  %v686_v30 = vadd.f32 %v2115_v15, %v659_v27  ;;  %v664_v31 = vmul.f32 %v1795_v28, %v2110_v13 }
  0xdf   : > { %v588_v32 = vpop.f32.mrf.mxu0 }
  0xe0   : > { %728 = vst.msk [vmem:[#allocation2 + $0x30] sm:$0xff] %vm387_vm1, %v708_v29  ;;  %v706_v33 = vmax.f32 %v686_v30, 0.0  ;;  %v691_v34 = vadd.f32 %v2115_v15, %v664_v31  ;;  %v662_v35 = vmul.f32 %v2110_v13, %v588_v32 }
  0xe1   : > { %v1796_v36 = vpop.f32.mrf.mxu0 }
  0xe2   : > { %726 = vst.msk [vmem:[#allocation2 + $0x10] sm:$0xff] %vm387_vm1, %v706_v33  ;;  %v711_v37 = vmax.f32 %v691_v34, 0.0  ;;  %v689_v38 = vadd.f32 %v2115_v15, %v662_v35  ;;  %v665_v39 = vmul.f32 %v1796_v36, %v2110_v13 }
  0xe3   : > { %v591_v40 = vpop.f32.mrf.mxu0 }
  0xe4   : > { %731 = vst.msk [vmem:[#allocation2 + $0x68] sm:$0xff] %vm387_vm1, %v711_v37  ;;  %v709_v41 = vmax.f32 %v689_v38, 0.0  ;;  %v692_v42 = vadd.f32 %v2115_v15, %v665_v39  ;;  %v663_v43 = vmul.f32 %v2110_v13, %v591_v40 }
  0xe5   : > { %v1799_v44 = vpop.f32.mrf.mxu0 }
  0xe6   : > { %729 = vst.msk [vmem:[#allocation2 + $0x48] sm:$0xff] %vm387_vm1, %v709_v41  ;;  %v712_v45 = vmax.f32 %v692_v42, 0.0  ;;  %v690_v46 = vadd.f32 %v2115_v15, %v663_v43  ;;  %v668_v47 = vmul.f32 %v1799_v44, %v2110_v13 }
  0xe7   : > { %v604_v48 = vpop.f32.mrf.mxu0 }
  0xe8   : > { %732 = vst.msk [vmem:[#allocation2 + $0x70] sm:$0xff] %vm387_vm1, %v712_v45  ;;  %v710_v49 = vmax.f32 %v690_v46, 0.0  ;;  %v695_v50 = vadd.f32 %v2115_v15, %v668_v47  ;;  %v666_v51 = vmul.f32 %v2110_v13, %v604_v48 }
  0xe9   : > { %v1800_v52 = vpop.f32.mrf.mxu0 }
  0xea   : > { %730 = vst.msk [vmem:[#allocation2 + $0x50] sm:$0xff] %vm387_vm1, %v710_v49  ;;  %v715_v53 = vmax.f32 %v695_v50, 0.0  ;;  %v693_v54 = vadd.f32 %v2115_v15, %v666_v51  ;;  %v669_v55 = vmul.f32 %v1800_v52, %v2110_v13 }
  0xeb   : > { %v607_v56 = vpop.f32.mrf.mxu0 }
  0xec   : > { %735 = vst.msk [vmem:[#allocation2 + $0xa8] sm:$0xff] %vm387_vm1, %v715_v53  ;;  %v713_v57 = vmax.f32 %v693_v54, 0.0  ;;  %v696_v58 = vadd.f32 %v2115_v15, %v669_v55  ;;  %v667_v59 = vmul.f32 %v2110_v13, %v607_v56 }
  0xed   : > { %v1803_v60 = vpop.f32.mrf.mxu0 }
  0xee   : > { %733 = vst.msk [vmem:[#allocation2 + $0x88] sm:$0xff] %vm387_vm1, %v713_v57  ;;  %v716_v61 = vmax.f32 %v696_v58, 0.0  ;;  %v694_v62 = vadd.f32 %v2115_v15, %v667_v59  ;;  %v672_v63 = vmul.f32 %v1803_v60, %v2110_v13 }
  0xef   : > { %v620_v0 = vpop.f32.mrf.mxu0 }
  0xf0   : > { %736 = vst.msk [vmem:[#allocation2 + $0xb0] sm:$0xff] %vm387_vm1, %v716_v61  ;;  %v714_v1 = vmax.f32 %v694_v62, 0.0  ;;  %v699_v2 = vadd.f32 %v2115_v15, %v672_v63  ;;  %v670_v3 = vmul.f32 %v2110_v13, %v620_v0 }
  0xf1   : > { %v1804_v4 = vpop.f32.mrf.mxu0 }
  0xf2   : > { %734 = vst.msk [vmem:[#allocation2 + $0x90] sm:$0xff] %vm387_vm1, %v714_v1  ;;  %v719_v5 = vmax.f32 %v699_v2, 0.0  ;;  %v697_v6 = vadd.f32 %v2115_v15, %v670_v3  ;;  %v673_v7 = vmul.f32 %v1804_v4, %v2110_v13 }
  0xf3   : > { %v623_v8 = vpop.f32.mrf.mxu0 }
  0xf4   : > { %739 = vst.msk [vmem:[#allocation2 + $0xe8] sm:$0xff] %vm387_vm1, %v719_v5  ;;  %v717_v9 = vmax.f32 %v697_v6, 0.0  ;;  %v700_v10 = vadd.f32 %v2115_v15, %v673_v7  ;;  %v671_v11 = vmul.f32 %v2110_v13, %v623_v8 }
  0xf5   : > { %v1807_v12 = vpop.f32.mrf.mxu0 }
  0xf6   : > { %737 = vst.msk [vmem:[#allocation2 + $0xc8] sm:$0xff] %vm387_vm1, %v717_v9  ;;  %v720_v14 = vmax.f32 %v700_v10, 0.0  ;;  %v698_v16 = vadd.f32 %v2115_v15, %v671_v11  ;;  %v676_v17 = vmul.f32 %v1807_v12, %v2110_v13 }
  0xf7   : > { %v636_v18 = vpop.f32.mrf.mxu0 }
  0xf8   : > { %740 = vst.msk [vmem:[#allocation2 + $0xf0] sm:$0xff] %vm387_vm1, %v720_v14  ;;  %v718_v19 = vmax.f32 %v698_v16, 0.0  ;;  %v703_v20 = vadd.f32 %v2115_v15, %v676_v17  ;;  %v674_v21 = vmul.f32 %v2110_v13, %v636_v18 }
  0xf9   : > { %v1808_v22 = vpop.f32.mrf.mxu0 }
  0xfa   : > { %738 = vst.msk [vmem:[#allocation2 + $0xd0] sm:$0xff] %vm387_vm1, %v718_v19  ;;  %v723_v23 = vmax.f32 %v703_v20, 0.0  ;;  %v701_v24 = vadd.f32 %v2115_v15, %v674_v21  ;;  %v677_v25 = vmul.f32 %v1808_v22, %v2110_v13 }
  0xfb   : > { %v639_v26 = vpop.f32.mrf.mxu0 }
  0xfc   : > { %743 = vst.msk [vmem:[#allocation2 + $0x128] sm:$0xff] %vm387_vm1, %v723_v23  ;;  %v721_v27 = vmax.f32 %v701_v24, 0.0  ;;  %v704_v28 = vadd.f32 %v2115_v15, %v677_v25  ;;  %v675_v29 = vmul.f32 %v2110_v13, %v639_v26 }
  0xfe   : > { %741 = vst.msk [vmem:[#allocation2 + $0x108] sm:$0xff] %vm387_vm1, %v721_v27  ;;  %v724_v30 = vmax.f32 %v704_v28, 0.0  ;;  %v702_v31 = vadd.f32 %v2115_v15, %v675_v29  ;;  %748 = sbr.rel (%p1687_p7) target bundleno = 263 (0x107), region = 64 }
 0x100   : > { %744 = vst.msk [vmem:[#allocation2 + $0x130] sm:$0xff] %vm387_vm1, %v724_v30  ;;  %v722_v32 = vmax.f32 %v702_v31, 0.0 }
 0x102   : > { %742 = vst.msk [vmem:[#allocation2 + $0x110] sm:$0xff] %vm387_vm1, %v722_v32 }
 0x103   : > { %v1927_v33 = vmov 0.0  }
 0x104   : > { %749 = vst.msk [vmem:[#allocation2] sm:$0xff] %vm387_vm1, %v1927_v33  ;;  %750 = vst.msk [vmem:[#allocation2 + $0x8] sm:$0xff] %vm387_vm1, %v1927_v33 }
 0x105   : > { %751 = vst.msk [vmem:[#allocation2 + $0x10] sm:$0xff] %vm387_vm1, %v1927_v33 }
 0x106   : > { %752 = vst.msk [vmem:[#allocation2 + $0x18] sm:$0x1] %vm391_vm2, %v1927_v33 }
 0x107 PF: > { %p1688_p8 = scmp.ne.s32.totalorder %s1908_s13, 1 }
 0x109   : > { %756 = sbr.rel (%p1688_p8) target bundleno = 274 (0x112), region = 68 }
 0x10e   : > { %v1928_v13 = vmov 0.0  }
 0x10f   : > { %758 = vst.msk [vmem:[#allocation2 + $0x120] sm:$0xff] %vm387_vm1, %v1928_v13  ;;  %759 = vst.msk [vmem:[#allocation2 + $0x128] sm:$0xff] %vm387_vm1, %v1928_v13 }
 0x110   : > { %760 = vst.msk [vmem:[#allocation2 + $0x130] sm:$0xff] %vm387_vm1, %v1928_v13 }
 0x111   : > { %761 = vst.msk [vmem:[#allocation2 + $0x138] sm:$0x1] %vm391_vm2, %v1928_v13 }
 0x112 PF: > { %v1884_v15 = vld [vmem:[%s2643_s7 + $0x8] sm:$0xff]   ;;  %v781_v34 = vlaneseq  ;;  %v1885_v35 = vld [vmem:[%s2643_s7] sm:$0xff]   ;;  %v818_v46 = vld [vmem:[#allocation2 + $0x10] sm:$0xff] }
 0x113   : > { %1809 = vmatprep.subr.bf16.mxu1 %v1884_v15  ;;  %v762_v37 = vld [vmem:[%s2640_s4] sm:$0x7]  ;;  %v763_v38 = vld [vmem:[%s2640_s4 + $0x4] sm:$0x7]  ;;  %v764_v39 = vld [vmem:[%s2640_s4 + $0x8] sm:$0x7] }
 0x114   : > { %1810 = vmatpush3.bf16.msra.mxu1 %v1884_v15  ;;  %v782_v36 = vshrl.u32 %v781_v34, 7  ;;  %v765_v40 = vld [vmem:[#allocation2 + $0x7] sm:$0xff]  ;;  %v766_v44 = vld [vmem:[#allocation2 + $0xf] sm:$0xff] }
 0x115   : > { %1811 = vmatprep.subr.bf16.mxu1 %v1885_v35  ;;  %v817_v45 = vld [vmem:[#allocation2 + $0x8] sm:$0xff]  ;;  %v870_v50 = vld [vmem:[#allocation2 + $0x11] sm:$0xff] }
 0x116   : > { %v783_v41 = vsub.s32 0, %v782_v36  ;;  %v835_v42 = vsub.s32 1, %v782_v36  ;;  %v887_v43 = vsub.s32 2, %v782_v36  ;;  %v869_v49 = vld [vmem:[#allocation2 + $0x9] sm:$0xff]  ;;  %v1027_v10 = vld [vmem:[#allocation2 + $0x31] sm:$0xff] }
 0x117   : > { %v922_v61 = vld [vmem:[#allocation2 + $0x27] sm:$0xff]  ;;  %v923_v62 = vld [vmem:[#allocation2 + $0x2f] sm:$0xff] }
 0x118   : > { %1812 = vmatpush3.bf16.msra.mxu1 %v1885_v35  ;;  %v2202_v47 = vrot.slane %v762_v37, %v783_v41  ;;  %v2204_v48 = vrot.slane %v762_v37, %v835_v42  ;;  %v2206_v51 = vrot.slane %v762_v37, %v887_v43  ;;  %v2208_v52 = vrot.slane %v763_v38, %v783_v41  ;;  %v974_v3 = vld [vmem:[#allocation2 + $0x28] sm:$0xff]  ;;  %v975_v4 = vld [vmem:[#allocation2 + $0x30] sm:$0xff] }
 0x119   : > { %v2210_v53 = vrot.slane %v763_v38, %v835_v42  ;;  %v2212_v54 = vrot.slane %v763_v38, %v887_v43  ;;  %v2214_v55 = vrot.slane %v764_v39, %v783_v41  ;;  %v2216_v56 = vrot.slane %v764_v39, %v835_v42  ;;  %v1026_v5 = vld [vmem:[#allocation2 + $0x29] sm:$0xff]  ;;  %v1184_v32 = vld [vmem:[#allocation2 + $0x51] sm:$0xff] }
 0x11a   : > { %v785_v57 = vmul.f32 %v2202_v47, %v765_v40  ;;  %v786_v58 = vmul.f32 %v2202_v47, %v766_v44  ;;  %v837_v59 = vmul.f32 %v2204_v48, %v817_v45  ;;  %v838_v60 = vmul.f32 %v2204_v48, %v818_v46  ;;  %v1079_v11 = vld [vmem:[#allocation2 + $0x47] sm:$0xff]  ;;  %v1080_v12 = vld [vmem:[#allocation2 + $0x4f] sm:$0xff] }
 0x11b   : > { %v889_v63 = vmul.f32 %v2206_v51, %v869_v49  ;;  %v890_v0 = vmul.f32 %v2206_v51, %v870_v50  ;;  %v942_v1 = vmul.f32 %v2208_v52, %v922_v61  ;;  %v943_v2 = vmul.f32 %v2208_v52, %v923_v62  ;;  %v1131_v19 = vld [vmem:[#allocation2 + $0x48] sm:$0xff]  ;;  %v1132_v20 = vld [vmem:[#allocation2 + $0x50] sm:$0xff] }
 0x11c   : > { %v853_v6 = vadd.f32 %v837_v59, %v785_v57  ;;  %v854_v7 = vadd.f32 %v838_v60, %v786_v58  ;;  %v994_v8 = vmul.f32 %v2210_v53, %v974_v3  ;;  %v995_v9 = vmul.f32 %v2210_v53, %v975_v4  ;;  %v1183_v31 = vld [vmem:[#allocation2 + $0x49] sm:$0xff] }
 0x11d   : > { %v1046_v14 = vmul.f32 %v2212_v54, %v1026_v5  ;;  %v1047_v16 = vmul.f32 %v2212_v54, %v1027_v10  ;;  %v1099_v17 = vmul.f32 %v2214_v55, %v1079_v11  ;;  %v1100_v18 = vmul.f32 %v2214_v55, %v1080_v12  ;;  %v2249_v57 = vld [vmem:[#allocation2 + $0x67] sm:$0xff]  ;;  %v2251_v58 = vld [vmem:[#allocation2 + $0x6f] sm:$0xff] }
 0x11e   : > { %v905_v21 = vadd.f32 %v889_v63, %v853_v6  ;;  %v906_v22 = vadd.f32 %v890_v0, %v854_v7  ;;  %v1151_v23 = vmul.f32 %v2216_v56, %v1131_v19  ;;  %v1152_v24 = vmul.f32 %v2216_v56, %v1132_v20  ;;  %v2258_v63 = vld [vmem:[#allocation2 + $0x68] sm:$0xff]  ;;  %v2266_v6 = vld [vmem:[#allocation2 + $0x71] sm:$0xff] }
 0x11f   : > { %v2234_v25 = vrot.slane %v764_v39, %v887_v43  ;;  %v787_v26 = vmul.f32 %v922_v61, %v2202_v47  ;;  %v788_v27 = vmul.f32 %v923_v62, %v2202_v47  ;;  %v839_v28 = vmul.f32 %v974_v3, %v2204_v48  ;;  %v2260_v3 = vld [vmem:[#allocation2 + $0x70] sm:$0xff] }
 0x120   : > { %v958_v29 = vadd.f32 %v942_v1, %v905_v21  ;;  %v959_v30 = vadd.f32 %v943_v2, %v906_v22  ;;  %v840_v33 = vmul.f32 %v975_v4, %v2204_v48  ;;  %v891_v13 = vmul.f32 %v1026_v5, %v2206_v51  ;;  %v2264_v5 = vld [vmem:[#allocation2 + $0x69] sm:$0xff]  ;;  %v2278_v21 = vld [vmem:[%s2641_s5] ss:$0 sm:$0xff] }
 0x121   : > { %v1203_v15 = vmul.f32 %v2234_v25, %v1183_v31  ;;  %v1204_v34 = vmul.f32 %v2234_v25, %v1184_v32  ;;  %v855_v35 = vadd.f32 %v839_v28, %v787_v26  ;;  %v892_v36 = vmul.f32 %v1027_v10, %v2206_v51 }
 0x122   : > { %v1010_v37 = vadd.f32 %v994_v8, %v958_v29  ;;  %v1011_v38 = vadd.f32 %v995_v9, %v959_v30  ;;  %v856_v39 = vadd.f32 %v840_v33, %v788_v27  ;;  %v944_v40 = vmul.f32 %v1079_v11, %v2208_v52 }
 0x123   : > { %v907_v41 = vadd.f32 %v891_v13, %v855_v35  ;;  %v945_v42 = vmul.f32 %v1080_v12, %v2208_v52  ;;  %v996_v43 = vmul.f32 %v1131_v19, %v2210_v53  ;;  %v997_v44 = vmul.f32 %v1132_v20, %v2210_v53 }
 0x124   : > { %v1062_v45 = vadd.f32 %v1046_v14, %v1010_v37  ;;  %v1063_v46 = vadd.f32 %v1047_v16, %v1011_v38  ;;  %v908_v49 = vadd.f32 %v892_v36, %v856_v39  ;;  %v1048_v50 = vmul.f32 %v1183_v31, %v2212_v54 }
 0x125   : > { %v960_v59 = vadd.f32 %v944_v40, %v907_v41  ;;  %v1049_v60 = vmul.f32 %v1184_v32, %v2212_v54  ;;  %v1101_v61 = vmul.f32 %v2214_v55, %v2249_v57  ;;  %v1102_v62 = vmul.f32 %v2214_v55, %v2251_v58 }
 0x126   : > { %v1115_v0 = vadd.f32 %v1099_v17, %v1062_v45  ;;  %v1116_v1 = vadd.f32 %v1100_v18, %v1063_v46  ;;  %v961_v2 = vadd.f32 %v945_v42, %v908_v49  ;;  %v1153_v4 = vmul.f32 %v2216_v56, %v2258_v63 }
 0x127   : > { %v1012_v7 = vadd.f32 %v996_v43, %v960_v59  ;;  %v1154_v8 = vmul.f32 %v2216_v56, %v2260_v3  ;;  %v1205_v9 = vmul.f32 %v2234_v25, %v2264_v5  ;;  %v1206_v10 = vmul.f32 %v2234_v25, %v2266_v6 }
 0x128   : > { %v1167_v14 = vadd.f32 %v1151_v23, %v1115_v0  ;;  %v1168_v16 = vadd.f32 %v1152_v24, %v1116_v1  ;;  %v1013_v17 = vadd.f32 %v997_v44, %v961_v2  ;;  %v789_v18 = vmul.f32 %v1079_v11, %v2202_v47  ;;  %v2287_v11 = vld [vmem:[%s2642_s6] ss:$0 sm:$0xff]  ;;  %v2307_v1 = vld [vmem:[#allocation2 + $0x87] sm:$0xff]  ;;  %v2309_v2 = vld [vmem:[#allocation2 + $0x8f] sm:$0xff] }
 0x129   : > { %v1064_v22 = vadd.f32 %v1048_v50, %v1012_v7  ;;  %v790_v26 = vmul.f32 %v1080_v12, %v2202_v47  ;;  %v841_v27 = vmul.f32 %v1131_v19, %v2204_v48  ;;  %v842_v28 = vmul.f32 %v1132_v20, %v2204_v48 }
 0x12a   : > { %v1219_v29 = vadd.f32 %v1203_v15, %v1167_v14  ;;  %v1220_v30 = vadd.f32 %v1204_v34, %v1168_v16  ;;  %v1065_v33 = vadd.f32 %v1049_v60, %v1013_v17  ;;  %v893_v23 = vmul.f32 %v1183_v31, %v2206_v51 }
 0x12b   : > { %v1117_v24 = vadd.f32 %v1101_v61, %v1064_v22  ;;  %v857_v13 = vadd.f32 %v841_v27, %v789_v18  ;;  %v858_v35 = vadd.f32 %v842_v28, %v790_v26  ;;  %v894_v36 = vmul.f32 %v1184_v32, %v2206_v51  ;;  %v1136_v18 = vld [vmem:[#allocation2 + $0x90] sm:$0xff] }
 0x12c   : > { %v1242_v12 = vmul.f32 %v2278_v21, %v1219_v29  ;;  %v1243_v19 = vmul.f32 %v2278_v21, %v1220_v30  ;;  %v1118_v20 = vadd.f32 %v1102_v62, %v1065_v33  ;;  %v946_v15 = vmul.f32 %v2249_v57, %v2208_v52  ;;  %v1187_v26 = vld [vmem:[#allocation2 + $0x89] sm:$0xff]  ;;  %v2321_v27 = vld [vmem:[#allocation2 + $0x91] sm:$0xff] }
 0x12d   : > { %v1169_v34 = vadd.f32 %v1153_v4, %v1117_v24  ;;  %v909_v31 = vadd.f32 %v893_v23, %v857_v13  ;;  %v910_v37 = vadd.f32 %v894_v36, %v858_v35  ;;  %v947_v38 = vmul.f32 %v2251_v58, %v2208_v52 }
 0x12e   : > { %v1265_v39 = vadd.f32 %v2287_v11, %v1242_v12  ;;  %v1266_v40 = vadd.f32 %v2287_v11, %v1243_v19  ;;  %v1170_v41 = vadd.f32 %v1154_v8, %v1118_v20  ;;  %v998_v32 = vmul.f32 %v2258_v63, %v2210_v53 }
 0x12f   : > { %v1221_v42 = vadd.f32 %v1205_v9, %v1169_v34  ;;  %v962_v43 = vadd.f32 %v946_v15, %v909_v31  ;;  %v963_v44 = vadd.f32 %v947_v38, %v910_v37  ;;  %v999_v45 = vmul.f32 %v2260_v3, %v2210_v53 }
 0x130   : > { %v1281_v46 = vmax.f32 %v1265_v39, 0.0  ;;  %v1282_v49 = vmax.f32 %v1266_v40, 0.0  ;;  %v1222_v50 = vadd.f32 %v1206_v10, %v1170_v41  ;;  %v1050_v59 = vmul.f32 %v2264_v5, %v2212_v54  ;;  %v2316_v10 = vld [vmem:[#allocation2 + $0x88] sm:$0xff] }
 0x131   : > { %v1244_v60 = vmul.f32 %v2278_v21, %v1221_v42  ;;  %v1014_v61 = vadd.f32 %v998_v32, %v962_v43  ;;  %v1015_v62 = vadd.f32 %v999_v45, %v963_v44  ;;  %v1051_v0 = vmul.f32 %v2266_v6, %v2212_v54  ;;  %v2350_v43 = vld [vmem:[#allocation2 + $0xa7] sm:$0xff] }
 0x132   : > { %v1297_v4 = vpack.c.bf16 %v1282_v49, %v1281_v46  ;;  %v1245_v7 = vmul.f32 %v2278_v21, %v1222_v50  ;;  %v1103_v8 = vmul.f32 %v2214_v55, %v2307_v1  ;;  %v1104_v9 = vmul.f32 %v2214_v55, %v2309_v2  ;;  %v2356_v49 = vld [vmem:[#allocation2 + $0xaf] sm:$0xff] }
 0x133   : > { %v1267_v14 = vadd.f32 %v2287_v11, %v1244_v60  ;;  %v1066_v16 = vadd.f32 %v1050_v59, %v1014_v61  ;;  %v1067_v17 = vadd.f32 %v1051_v0, %v1015_v62  ;;  %v1155_v22 = vmul.f32 %v2216_v56, %v2316_v10  ;;  %v2360_v59 = vld [vmem:[#allocation2 + $0xa8] sm:$0xff]  ;;  %v1138_v0 = vld [vmem:[#allocation2 + $0xb0] sm:$0xff] }
 0x134   : > { %1813 = vmatprep.mubr.msk.bf16.mxu1 %vm387_vm1, %v1297_v4  ;;  %v1268_v28 = vadd.f32 %v2287_v11, %v1245_v7  ;;  %v1156_v29 = vmul.f32 %v2216_v56, %v1136_v18  ;;  %v1207_v30 = vmul.f32 %v2234_v25, %v1187_v26  ;;  %v1208_v33 = vmul.f32 %v2234_v25, %v2321_v27  ;;  %v1189_v7 = vld [vmem:[#allocation2 + $0xa9] sm:$0xff] }
 0x135   : > { %v1283_v23 = vmax.f32 %v1267_v14, 0.0  ;;  %v1119_v24 = vadd.f32 %v1103_v8, %v1066_v16  ;;  %v1120_v13 = vadd.f32 %v1104_v9, %v1067_v17  ;;  %v791_v35 = vmul.f32 %v2249_v57, %v2202_v47  ;;  %v1190_v16 = vld [vmem:[#allocation2 + $0xb1] sm:$0xff] }
 0x136   : > { %v1284_v36 = vmax.f32 %v1268_v28, 0.0  ;;  %v792_v12 = vmul.f32 %v2251_v58, %v2202_v47  ;;  %v843_v19 = vmul.f32 %v2258_v63, %v2204_v48  ;;  %v844_v20 = vmul.f32 %v2260_v3, %v2204_v48 }
 0x137   : > { %v1171_v15 = vadd.f32 %v1155_v22, %v1119_v24  ;;  %v1172_v34 = vadd.f32 %v1156_v29, %v1120_v13  ;;  %v895_v31 = vmul.f32 %v2264_v5, %v2206_v51  ;;  %v896_v37 = vmul.f32 %v2266_v6, %v2206_v51 }
 0x138   : > { %v1298_v38 = vpack.c.bf16 %v1284_v36, %v1283_v23  ;;  %v859_v57 = vadd.f32 %v843_v19, %v791_v35  ;;  %v860_v39 = vadd.f32 %v844_v20, %v792_v12  ;;  %v948_v58 = vmul.f32 %v2307_v1, %v2208_v52 }
 0x139   : > { %v1223_v40 = vadd.f32 %v1207_v30, %v1171_v15  ;;  %v1224_v41 = vadd.f32 %v1208_v33, %v1172_v34  ;;  %v949_v63 = vmul.f32 %v2309_v2, %v2208_v52  ;;  %v1000_v3 = vmul.f32 %v2316_v10, %v2210_v53 }
 0x13a   : > { %1814 = vmatmul.mubr.msk.bf16.vlgmr.msra.gmra.mxu1 %vm387_vm1, %v1298_v38  ;;  %v911_v5 = vadd.f32 %v895_v31, %v859_v57  ;;  %v912_v32 = vadd.f32 %v896_v37, %v860_v39  ;;  %v1001_v6 = vmul.f32 %v1136_v18, %v2210_v53  ;;  %v1052_v42 = vmul.f32 %v1187_v26, %v2212_v54 }
 0x13b   : > { %v1246_v44 = vmul.f32 %v2278_v21, %v1223_v40  ;;  %v1247_v45 = vmul.f32 %v2278_v21, %v1224_v41  ;;  %v1053_v46 = vmul.f32 %v2321_v27, %v2212_v54  ;;  %v1105_v50 = vmul.f32 %v2214_v55, %v2350_v43  ;;  %v2391_v41 = vld [vmem:[#allocation2 + $0xc7] sm:$0xff] }
 0x13c   : > { %v964_v60 = vadd.f32 %v948_v58, %v911_v5  ;;  %v965_v61 = vadd.f32 %v949_v63, %v912_v32  ;;  %v1106_v62 = vmul.f32 %v2214_v55, %v2356_v49  ;;  %v1157_v4 = vmul.f32 %v2216_v56, %v2360_v59  ;;  %v2393_v63 = vld [vmem:[#allocation2 + $0xcf] sm:$0xff] }
 0x13d   : > { %v1269_v8 = vadd.f32 %v2287_v11, %v1246_v44  ;;  %v1270_v9 = vadd.f32 %v2287_v11, %v1247_v45  ;;  %v1158_v14 = vmul.f32 %v2216_v56, %v1138_v0  ;;  %v1209_v17 = vmul.f32 %v2234_v25, %v1189_v7 }
 0x13e   : > { %v1016_v22 = vadd.f32 %v1000_v3, %v964_v60  ;;  %v1017_v28 = vadd.f32 %v1001_v6, %v965_v61  ;;  %v1210_v29 = vmul.f32 %v2234_v25, %v1190_v16  ;;  %v793_v30 = vmul.f32 %v2307_v1, %v2202_v47  ;;  %v2395_v3 = vld [vmem:[#allocation2 + $0xc8] sm:$0xff] }
 0x13f   : > { %v1285_v33 = vmax.f32 %v1269_v8, 0.0  ;;  %v1286_v23 = vmax.f32 %v1270_v9, 0.0  ;;  %v794_v24 = vmul.f32 %v2309_v2, %v2202_v47  ;;  %v845_v13 = vmul.f32 %v2316_v10, %v2204_v48  ;;  %v2407_v61 = vld [vmem:[#allocation2 + $0xc9] sm:$0xff] }
 0x140   : > { %v1068_v35 = vadd.f32 %v1052_v42, %v1016_v22  ;;  %v1069_v36 = vadd.f32 %v1053_v46, %v1017_v28  ;;  %v846_v12 = vmul.f32 %v1136_v18, %v2204_v48  ;;  %v897_v19 = vmul.f32 %v1187_v26, %v2206_v51  ;;  %v2401_v42 = vld [vmem:[#allocation2 + $0xd0] sm:$0xff] }
 0x141   : > { %v1299_v20 = vpack.c.bf16 %v1286_v23, %v1285_v33  ;;  %v861_v15 = vadd.f32 %v845_v13, %v793_v30  ;;  %v898_v34 = vmul.f32 %v2321_v27, %v2206_v51  ;;  %v950_v1 = vmul.f32 %v2350_v43, %v2208_v52 }
 0x142   : > { %v1121_v31 = vadd.f32 %v1105_v50, %v1068_v35  ;;  %v1122_v37 = vadd.f32 %v1106_v62, %v1069_v36  ;;  %v862_v2 = vadd.f32 %v846_v12, %v794_v24  ;;  %v951_v10 = vmul.f32 %v2356_v49, %v2208_v52  ;;  %v2409_v62 = vld [vmem:[#allocation2 + $0xd1] sm:$0xff] }
 0x143   : > { %1817 = vmatprep.mubr.msk.bf16.mxu1 %vm387_vm1, %v1299_v20  ;;  %v913_v38 = vadd.f32 %v897_v19, %v861_v15  ;;  %v1002_v18 = vmul.f32 %v2360_v59, %v2210_v53  ;;  %v1003_v26 = vmul.f32 %v1138_v0, %v2210_v53  ;;  %v1054_v57 = vmul.f32 %v1189_v7, %v2212_v54 }
 0x144   : > { %v1173_v27 = vadd.f32 %v1157_v4, %v1121_v31  ;;  %v1174_v39 = vadd.f32 %v1158_v14, %v1122_v37  ;;  %v914_v58 = vadd.f32 %v898_v34, %v862_v2  ;;  %v1055_v40 = vmul.f32 %v1190_v16, %v2212_v54 }
 0x145   : > { %v966_v5 = vadd.f32 %v950_v1, %v913_v38  ;;  %v1107_v32 = vmul.f32 %v2214_v55, %v2391_v41  ;;  %v1108_v6 = vmul.f32 %v2214_v55, %v2393_v63  ;;  %v1159_v44 = vmul.f32 %v2216_v56, %v2395_v3 }
 0x146   : > { %v1225_v45 = vadd.f32 %v1209_v17, %v1173_v27  ;;  %v1226_v46 = vadd.f32 %v1210_v29, %v1174_v39  ;;  %v967_v50 = vadd.f32 %v951_v10, %v914_v58  ;;  %v1160_v60 = vmul.f32 %v2216_v56, %v2401_v42  ;;  %v2440_v39 = vld [vmem:[#allocation2 + $0xe7] sm:$0xff]  ;;  %v2442_v58 = vld [vmem:[#allocation2 + $0xef] sm:$0xff] }
 0x147   : > { %v1018_v4 = vadd.f32 %v1002_v18, %v966_v5  ;;  %v1211_v8 = vmul.f32 %v2234_v25, %v2407_v61  ;;  %v1212_v9 = vmul.f32 %v2234_v25, %v2409_v62  ;;  %v795_v14 = vmul.f32 %v2350_v43, %v2202_v47 }
 0x148   : > { %v1248_v17 = vmul.f32 %v2278_v21, %v1225_v45  ;;  %v1249_v22 = vmul.f32 %v2278_v21, %v1226_v46  ;;  %v1019_v28 = vadd.f32 %v1003_v26, %v967_v50  ;;  %v796_v29 = vmul.f32 %v2356_v49, %v2202_v47 }
 0x149   : > { %v1070_v30 = vadd.f32 %v1054_v57, %v1018_v4  ;;  %v847_v33 = vmul.f32 %v2360_v59, %v2204_v48  ;;  %v848_v23 = vmul.f32 %v1138_v0, %v2204_v48  ;;  %v899_v24 = vmul.f32 %v1189_v7, %v2206_v51 }
 0x14a   : > { %v1271_v13 = vadd.f32 %v2287_v11, %v1248_v17  ;;  %v1272_v43 = vadd.f32 %v2287_v11, %v1249_v22  ;;  %v1071_v35 = vadd.f32 %v1055_v40, %v1019_v28  ;;  %v900_v36 = vmul.f32 %v1190_v16, %v2206_v51  ;;  %v2444_v40 = vld [vmem:[#allocation2 + $0xe8] sm:$0xff] }
 0x14b   : > { %v1123_v12 = vadd.f32 %v1107_v32, %v1070_v30  ;;  %v863_v19 = vadd.f32 %v847_v33, %v795_v14  ;;  %v864_v20 = vadd.f32 %v848_v23, %v796_v29  ;;  %v952_v49 = vmul.f32 %v2391_v41, %v2208_v52 }
 0x14c   : > { %v1287_v15 = vmax.f32 %v1271_v13, 0.0  ;;  %v1288_v34 = vmax.f32 %v1272_v43, 0.0  ;;  %v1124_v59 = vadd.f32 %v1108_v6, %v1071_v35  ;;  %v953_v0 = vmul.f32 %v2393_v63, %v2208_v52 }
 0x14d   : > { %v1175_v7 = vadd.f32 %v1159_v44, %v1123_v12  ;;  %v915_v1 = vadd.f32 %v899_v24, %v863_v19  ;;  %v916_v31 = vadd.f32 %v900_v36, %v864_v20  ;;  %v1004_v37 = vmul.f32 %v2395_v3, %v2210_v53  ;;  %v2451_v44 = vld [vmem:[#allocation2 + $0xf0] sm:$0xff] }
 0x14e   : > { %v1300_v2 = vpack.c.bf16 %v1288_v34, %v1287_v15  ;;  %v1176_v16 = vadd.f32 %v1160_v60, %v1124_v59  ;;  %v1005_v10 = vmul.f32 %v2401_v42, %v2210_v53  ;;  %v1056_v38 = vmul.f32 %v2407_v61, %v2212_v54 }
 0x14f   : > { %v1227_v18 = vadd.f32 %v1211_v8, %v1175_v7  ;;  %v968_v26 = vadd.f32 %v952_v49, %v915_v1  ;;  %v969_v57 = vadd.f32 %v953_v0, %v916_v31  ;;  %v1057_v27 = vmul.f32 %v2409_v62, %v2212_v54  ;;  %v2458_v8 = vld [vmem:[#allocation2 + $0xe9] sm:$0xff] }
 0x150   : > { %1818 = vmatmul.mubr.msk.bf16.gmra.mxu1 %vm387_vm1, %v1300_v2  ;;  %v1228_v5 = vadd.f32 %v1212_v9, %v1176_v16  ;;  %v1109_v32 = vmul.f32 %v2214_v55, %v2440_v39  ;;  %v1110_v6 = vmul.f32 %v2214_v55, %v2442_v58  ;;  %v1161_v45 = vmul.f32 %v2216_v56, %v2444_v40  ;;  %v2460_v9 = vld [vmem:[#allocation2 + $0xf1] sm:$0xff]  ;;  %v1091_v16 = vld [vmem:[#allocation2 + $0x107] sm:$0xff] }
 0x151   : > { %v1250_v46 = vmul.f32 %v2278_v21, %v1227_v18  ;;  %v1020_v50 = vadd.f32 %v1004_v37, %v968_v26  ;;  %v1021_v60 = vadd.f32 %v1005_v10, %v969_v57  ;;  %v1162_v4 = vmul.f32 %v2216_v56, %v2451_v44  ;;  %v1092_v10 = vld [vmem:[#allocation2 + $0x10f] sm:$0xff] }
 0x152   : > { %v1251_v14 = vmul.f32 %v2278_v21, %v1228_v5  ;;  %v1213_v17 = vmul.f32 %v2234_v25, %v2458_v8  ;;  %v1214_v22 = vmul.f32 %v2234_v25, %v2460_v9  ;;  %v797_v28 = vmul.f32 %v2391_v41, %v2202_v47  ;;  %v1144_v5 = vld [vmem:[#allocation2 + $0x110] sm:$0xff] }
 0x153   : > { %v1273_v29 = vadd.f32 %v2287_v11, %v1250_v46  ;;  %v1072_v30 = vadd.f32 %v1056_v38, %v1020_v50  ;;  %v1073_v33 = vadd.f32 %v1057_v27, %v1021_v60  ;;  %v798_v23 = vmul.f32 %v2393_v63, %v2202_v47  ;;  %v1143_v27 = vld [vmem:[#allocation2 + $0x108] sm:$0xff]  ;;  %v1196_v60 = vld [vmem:[#allocation2 + $0x111] sm:$0xff] }
 0x154   : > { %v1274_v24 = vadd.f32 %v2287_v11, %v1251_v14  ;;  %v849_v13 = vmul.f32 %v2395_v3, %v2204_v48  ;;  %v850_v43 = vmul.f32 %v2401_v42, %v2204_v48  ;;  %v901_v35 = vmul.f32 %v2407_v61, %v2206_v51  ;;  %v1195_v50 = vld [vmem:[#allocation2 + $0x109] sm:$0xff] }
 0x155   : > { %v1289_v36 = vmax.f32 %v1273_v29, 0.0  ;;  %v1125_v41 = vadd.f32 %v1109_v32, %v1072_v30  ;;  %v1126_v12 = vadd.f32 %v1110_v6, %v1073_v33  ;;  %v902_v19 = vmul.f32 %v2409_v62, %v2206_v51 }
 0x156   : > { %v1290_v20 = vmax.f32 %v1274_v24, 0.0  ;;  %v865_v49 = vadd.f32 %v849_v13, %v797_v28  ;;  %v866_v63 = vadd.f32 %v850_v43, %v798_v23  ;;  %v954_v15 = vmul.f32 %v2440_v39, %v2208_v52 }
 0x157   : > { %v1177_v34 = vadd.f32 %v1161_v45, %v1125_v41  ;;  %v1178_v3 = vadd.f32 %v1162_v4, %v1126_v12  ;;  %v955_v42 = vmul.f32 %v2442_v58, %v2208_v52  ;;  %v1006_v61 = vmul.f32 %v2444_v40, %v2210_v53 }
 0x158   : > { %v1301_v59 = vpack.c.bf16 %v1290_v20, %v1289_v36  ;;  %v917_v0 = vadd.f32 %v901_v35, %v865_v49  ;;  %v918_v7 = vadd.f32 %v902_v19, %v866_v63  ;;  %v1007_v62 = vmul.f32 %v2451_v44, %v2210_v53 }
 0x159   : > { %v1229_v1 = vadd.f32 %v1213_v17, %v1177_v34  ;;  %v1230_v31 = vadd.f32 %v1214_v22, %v1178_v3  ;;  %v1058_v37 = vmul.f32 %v2458_v8, %v2212_v54  ;;  %v1059_v2 = vmul.f32 %v2460_v9, %v2212_v54  ;;  %v1093_v3 = vld [vmem:[#allocation2 + $0x127] sm:$0xff] }
 0x15a   : > { %1821 = vmatprep.mubr.msk.bf16.mxu1 %vm387_vm1, %v1301_v59  ;;  %v970_v38 = vadd.f32 %v954_v15, %v917_v0  ;;  %v971_v18 = vadd.f32 %v955_v42, %v918_v7  ;;  %v1111_v26 = vmul.f32 %v2214_v55, %v1091_v16  ;;  %v1112_v57 = vmul.f32 %v2214_v55, %v1092_v10  ;;  %v1145_v7 = vld [vmem:[#allocation2 + $0x128] sm:$0xff] }
 0x15b   : > { %v1252_v32 = vmul.f32 %v2278_v21, %v1229_v1  ;;  %v1253_v6 = vmul.f32 %v2278_v21, %v1230_v31  ;;  %v1163_v45 = vmul.f32 %v2216_v56, %v1143_v27  ;;  %v1164_v46 = vmul.f32 %v2216_v56, %v1144_v5 }
 0x15c   : > { %v1022_v4 = vadd.f32 %v1006_v61, %v970_v38  ;;  %v1023_v14 = vadd.f32 %v1007_v62, %v971_v18  ;;  %v1215_v17 = vmul.f32 %v2234_v25, %v1195_v50  ;;  %v1216_v22 = vmul.f32 %v2234_v25, %v1196_v60  ;;  %v1146_v62 = vld [vmem:[#allocation2 + $0x130] sm:$0xff] }
 0x15d   : > { %v1275_v28 = vadd.f32 %v2287_v11, %v1252_v32  ;;  %v1276_v29 = vadd.f32 %v2287_v11, %v1253_v6  ;;  %v799_v30 = vmul.f32 %v2440_v39, %v2202_v47  ;;  %v800_v33 = vmul.f32 %v2442_v58, %v2202_v47  ;;  %v1198_v38 = vld [vmem:[#allocation2 + $0x131] sm:$0xff] }
 0x15e   : > { %v1074_v23 = vadd.f32 %v1058_v37, %v1022_v4  ;;  %v1075_v24 = vadd.f32 %v1059_v2, %v1023_v14  ;;  %v851_v13 = vmul.f32 %v2444_v40, %v2204_v48  ;;  %v852_v43 = vmul.f32 %v2451_v44, %v2204_v48 }
 0x15f   : > { %v1291_v35 = vmax.f32 %v1275_v28, 0.0  ;;  %v1292_v36 = vmax.f32 %v1276_v29, 0.0  ;;  %v903_v41 = vmul.f32 %v2458_v8, %v2206_v51  ;;  %v904_v12 = vmul.f32 %v2460_v9, %v2206_v51  ;;  %v1094_v8 = vld [vmem:[#allocation2 + $0x12f] sm:$0xff] }
 0x160   : > { %v1127_v39 = vadd.f32 %v1111_v26, %v1074_v23  ;;  %v1128_v19 = vadd.f32 %v1112_v57, %v1075_v24  ;;  %v867_v20 = vadd.f32 %v851_v13, %v799_v30  ;;  %v868_v47 = vadd.f32 %v852_v43, %v800_v33  ;;  %v2542_v24 = vld [vmem:[%s2644_s8] ss:$0 sm:$0xff]  ;;  %v1759_v13 = vld [vmem:[%s2080_s20 + $0x10] sm:$0xff]  }
 0x161   : > { %v1302_v58 = vpack.c.bf16 %v1292_v36, %v1291_v35  ;;  %v956_v49 = vmul.f32 %v1091_v16, %v2208_v52  ;;  %v957_v40 = vmul.f32 %v1092_v10, %v2208_v52  ;;  %v1008_v63 = vmul.f32 %v1143_v27, %v2210_v53  ;;  %v1197_v10 = vld [vmem:[#allocation2 + $0x129] sm:$0xff] }
 0x162   : > { %v1179_v48 = vadd.f32 %v1163_v45, %v1127_v39  ;;  %v1180_v44 = vadd.f32 %v1164_v46, %v1128_v19  ;;  %v919_v15 = vadd.f32 %v903_v41, %v867_v20  ;;  %v920_v34 = vadd.f32 %v904_v12, %v868_v47  ;;  %v1758_v35 = vld [vmem:[%s2080_s20 + $0x8] sm:$0xff]  }
 0x163   : > { %1822 = vmatmul.mubr.msk.bf16.gmra.mxu1 %vm387_vm1, %v1302_v58  ;;  %v1009_v51 = vmul.f32 %v1144_v5, %v2210_v53  ;;  %v1060_v9 = vmul.f32 %v1195_v50, %v2212_v54  ;;  %v1061_v42 = vmul.f32 %v1196_v60, %v2212_v54  ;;  %v1113_v1 = vmul.f32 %v2214_v55, %v1093_v3 }
 0x164   : > { %v1231_v61 = vadd.f32 %v1215_v17, %v1179_v48  ;;  %v1232_v59 = vadd.f32 %v1216_v22, %v1180_v44  ;;  %v972_v0 = vadd.f32 %v956_v49, %v919_v15  ;;  %v973_v52 = vadd.f32 %v957_v40, %v920_v34 }
 0x165   : > { %v1114_v31 = vmul.f32 %v2214_v55, %v1094_v8  ;;  %v1165_v54 = vmul.f32 %v2216_v56, %v1145_v7  ;;  %v1166_v18 = vmul.f32 %v2216_v56, %v1146_v62  ;;  %v1217_v55 = vmul.f32 %v2234_v25, %v1197_v10 }
 0x166   : > { %v1254_v37 = vmul.f32 %v2278_v21, %v1231_v61  ;;  %v1255_v2 = vmul.f32 %v2278_v21, %v1232_v59  ;;  %v1024_v16 = vadd.f32 %v1008_v63, %v972_v0  ;;  %v1025_v53 = vadd.f32 %v1009_v51, %v973_v52  ;;  %v1760_v61 = vld [vmem:[%s2080_s20 + $0x18] sm:$0xff]  }
 0x167   : > { %v1218_v32 = vmul.f32 %v2234_v25, %v1198_v38  ;;  %v1732_v36 = vunpack.c.l.bf16 %v1759_v13  ;;  %v1728_v19 = vunpack.c.l.bf16 %v1758_v35  ;;  %v1733_v40 = vunpack.c.h.bf16 %v1759_v13 }
 0x168   : > { %v1277_v26 = vadd.f32 %v2287_v11, %v1254_v37  ;;  %v1278_v57 = vadd.f32 %v2287_v11, %v1255_v2  ;;  %v1076_v27 = vadd.f32 %v1060_v9, %v1024_v16  ;;  %v1077_v5 = vadd.f32 %v1061_v42, %v1025_v53  ;;  %v1761_v9 = vld [vmem:[%s2080_s20 + $0x20] sm:$0xff]  }
 0x169   : > { %v1729_v34 = vunpack.c.h.bf16 %v1758_v35  ;;  %v1740_v0 = vunpack.c.l.bf16 %v1761_v9  ;;  %v1741_v53 = vunpack.c.h.bf16 %v1761_v9 }
 0x16a   : > { %v1293_v6 = vmax.f32 %v1277_v26, 0.0  ;;  %v1294_v45 = vmax.f32 %v1278_v57, 0.0  ;;  %v1129_v46 = vadd.f32 %v1113_v1, %v1076_v27  ;;  %v1130_v50 = vadd.f32 %v1114_v31, %v1077_v5 }
 0x16b   : > { %v1736_v1 = vunpack.c.l.bf16 %v1760_v61  ;;  %v1737_v26 = vunpack.c.h.bf16 %v1760_v61 }
 0x16c   : > { %v1303_v60 = vpack.c.bf16 %v1294_v45, %v1293_v6  ;;  %v1181_v4 = vadd.f32 %v1165_v54, %v1129_v46  ;;  %v1182_v14 = vadd.f32 %v1166_v18, %v1130_v50  ;;  %v1762_v6 = vld [vmem:[%s2080_s20 + $0x28] sm:$0xff]  }
 0x16d   : > { %v1745_v13 = vunpack.c.h.bf16 %v1762_v6 }
 0x16e   : > { %1825 = vmatprep.mubr.msk.bf16.mxu1 %vm387_vm1, %v1303_v60  ;;  %v1233_v56 = vadd.f32 %v1217_v55, %v1181_v4  ;;  %v1234_v17 = vadd.f32 %v1218_v32, %v1182_v14  ;;  %v1763_v55 = vld [vmem:[%s2080_s20 + $0x30] sm:$0xff]   ;;  %v1744_v14 = vunpack.c.l.bf16 %v1762_v6 }
 0x16f   : > { %v1748_v46 = vunpack.c.l.bf16 %v1763_v55 }
 0x170   : > { %v1256_v22 = vmul.f32 %v2278_v21, %v1233_v56  ;;  %v1257_v28 = vmul.f32 %v2278_v21, %v1234_v17  ;;  %v2548_v21 = vld [vmem:[%s2645_s9] ss:$0 sm:$0xff] }
 0x172   : > { %v1279_v29 = vadd.f32 %v2287_v11, %v1256_v22  ;;  %v1280_v25 = vadd.f32 %v2287_v11, %v1257_v28 }
 0x174   : > { %v1295_v30 = vmax.f32 %v1279_v29, 0.0  ;;  %v1296_v33 = vmax.f32 %v1280_v25, 0.0  ;;  %v1749_v29 = vunpack.c.h.bf16 %v1763_v55 }
 0x176   : > { %v1304_v23 = vpack.c.bf16 %v1296_v33, %v1295_v30 }
 0x178   : > { %1826 = vmatmul.mubr.msk.bf16.gmra.mxu1 %vm387_vm1, %v1304_v23 }
 0x1fa   : > { %v1815_v43 = vpop.f32.mrf.mxu1 }
 0x1fb   : > { %v1451_v11 = vmul.f32 %v1815_v43, %v2542_v24 }
 0x1fc   : > { %v1379_v41 = vpop.f32.mrf.mxu1 }
 0x1fd   : > { %v1474_v12 = vadd.f32 %v2548_v21, %v1451_v11  ;;  %v1449_v39 = vmul.f32 %v2542_v24, %v1379_v41 }
 0x1fe   : > { %v1816_v20 = vpop.f32.mrf.mxu1 }
 0x1ff   : > { %v1526_v47 = vadd.f32 %v1732_v36, %v1474_v12  ;;  %v1472_v58 = vadd.f32 %v2548_v21, %v1449_v39  ;;  %v1452_v49 = vmul.f32 %v1816_v20, %v2542_v24  ;;  %v1765_v36 = vld [vmem:[%s2080_s20 + $0x40] sm:$0xff]   ;;  %v1764_v12 = vld [vmem:[%s2080_s20 + $0x38] sm:$0xff]  }
 0x200   : > { %v1382_v63 = vpop.f32.mrf.mxu1  ;;  %v1753_v9 = vunpack.c.h.bf16 %v1764_v12 }
 0x201   : > { %1542 = vst.msk [vmem:[%s2085_s22 + $0x10] sm:$0xff] %vm503_vm3, %v1526_v47  ;;  %v1524_v48 = vadd.f32 %v1728_v19, %v1472_v58  ;;  %v1475_v44 = vadd.f32 %v2548_v21, %v1452_v49  ;;  %v1450_v15 = vmul.f32 %v2542_v24, %v1382_v63  ;;  %v1756_v19 = vunpack.c.l.bf16 %v1765_v36 }
 0x202   : > { %v1752_v49 = vunpack.c.l.bf16 %v1764_v12 }
 0x203   : > { %1540 = vst.msk [vmem:[%s2085_s22] sm:$0xff] %vm503_vm3, %v1524_v48  ;;  %v1527_v3 = vadd.f32 %v1733_v40, %v1475_v44  ;;  %v1473_v8 = vadd.f32 %v2548_v21, %v1450_v15  ;;  %v1757_v15 = vunpack.c.h.bf16 %v1765_v36 }
 0x205   : > { %1543 = vst.msk [vmem:[%s2085_s22 + $0x18] sm:$0xff] %vm503_vm3, %v1527_v3  ;;  %v1525_v51 = vadd.f32 %v1729_v34, %v1473_v8 }
 0x207   : > { %1541 = vst.msk [vmem:[%s2085_s22 + $0x8] sm:$0xff] %vm503_vm3, %v1525_v51 }
 0x210   : > { %v1819_v42 = vpop.f32.mrf.mxu1 }
 0x211   : > { %v1455_v59 = vmul.f32 %v1819_v42, %v2542_v24 }
 0x212   : > { %v1395_v52 = vpop.f32.mrf.mxu1 }
 0x213   : > { %v1478_v7 = vadd.f32 %v2548_v21, %v1455_v59  ;;  %v1453_v62 = vmul.f32 %v2542_v24, %v1395_v52 }
 0x214   : > { %v1820_v31 = vpop.f32.mrf.mxu1 }
 0x215   : > { %v1530_v37 = vadd.f32 %v1740_v0, %v1478_v7  ;;  %v1476_v2 = vadd.f32 %v2548_v21, %v1453_v62  ;;  %v1456_v16 = vmul.f32 %v1820_v31, %v2542_v24 }
 0x216   : > { %v1398_v10 = vpop.f32.mrf.mxu1 }
 0x217   : > { %1546 = vst.msk [vmem:[%s2085_s22 + $0x30] sm:$0xff] %vm503_vm3, %v1530_v37  ;;  %v1528_v38 = vadd.f32 %v1736_v1, %v1476_v2  ;;  %v1479_v54 = vadd.f32 %v2548_v21, %v1456_v16  ;;  %v1454_v18 = vmul.f32 %v2542_v24, %v1398_v10 }
 0x219   : > { %1544 = vst.msk [vmem:[%s2085_s22 + $0x20] sm:$0xff] %vm503_vm3, %v1528_v38  ;;  %v1531_v57 = vadd.f32 %v1741_v53, %v1479_v54  ;;  %v1477_v27 = vadd.f32 %v2548_v21, %v1454_v18 }
 0x21b   : > { %1547 = vst.msk [vmem:[%s2085_s22 + $0x38] sm:$0xff] %vm503_vm3, %v1531_v57  ;;  %v1529_v5 = vadd.f32 %v1737_v26, %v1477_v27 }
 0x21d   : > { %1545 = vst.msk [vmem:[%s2085_s22 + $0x28] sm:$0xff] %vm503_vm3, %v1529_v5 }
 0x223   : > { %v1823_v32 = vpop.f32.mrf.mxu1 }
 0x224   : > { %v1459_v45 = vmul.f32 %v1823_v32, %v2542_v24 }
 0x225   : > { %v1411_v50 = vpop.f32.mrf.mxu1 }
 0x226   : > { %v1482_v60 = vadd.f32 %v2548_v21, %v1459_v45  ;;  %v1457_v4 = vmul.f32 %v2542_v24, %v1411_v50 }
 0x227   : > { %v1824_v56 = vpop.f32.mrf.mxu1 }
 0x228   : > { %v1534_v17 = vadd.f32 %v1748_v46, %v1482_v60  ;;  %v1480_v22 = vadd.f32 %v2548_v21, %v1457_v4  ;;  %v1460_v28 = vmul.f32 %v1824_v56, %v2542_v24 }
 0x229   : > { %v1414_v25 = vpop.f32.mrf.mxu1 }
 0x22a   : > { %1550 = vst.msk [vmem:[%s2085_s22 + $0x50] sm:$0xff] %vm503_vm3, %v1534_v17  ;;  %v1532_v30 = vadd.f32 %v1744_v14, %v1480_v22  ;;  %v1483_v33 = vadd.f32 %v2548_v21, %v1460_v28  ;;  %v1458_v23 = vmul.f32 %v2542_v24, %v1414_v25 }
 0x22c   : > { %1548 = vst.msk [vmem:[%s2085_s22 + $0x40] sm:$0xff] %vm503_vm3, %v1532_v30  ;;  %v1535_v43 = vadd.f32 %v1749_v29, %v1483_v33  ;;  %v1481_v35 = vadd.f32 %v2548_v21, %v1458_v23 }
 0x22e   : > { %1551 = vst.msk [vmem:[%s2085_s22 + $0x58] sm:$0xff] %vm503_vm3, %v1535_v43  ;;  %v1533_v11 = vadd.f32 %v1745_v13, %v1481_v35 }
 0x230   : > { %1549 = vst.msk [vmem:[%s2085_s22 + $0x48] sm:$0xff] %vm503_vm3, %v1533_v11 }
 0x238   : > { %v1827_v41 = vpop.f32.mrf.mxu1 }
 0x239   : > { %v1463_v39 = vmul.f32 %v1827_v41, %v2542_v24 }
 0x23a   : > { %v1427_v20 = vpop.f32.mrf.mxu1 }
 0x23b   : > { %v1486_v47 = vadd.f32 %v2548_v21, %v1463_v39  ;;  %v1461_v58 = vmul.f32 %v2542_v24, %v1427_v20 }
 0x23c   : > { %v1828_v40 = vpop.f32.mrf.mxu1 }
 0x23d   : > { %v1538_v63 = vadd.f32 %v1756_v19, %v1486_v47  ;;  %v1484_v48 = vadd.f32 %v2548_v21, %v1461_v58  ;;  %v1464_v44 = vmul.f32 %v1828_v40, %v2542_v24 }
 0x23e   : > { %v1430_v34 = vpop.f32.mrf.mxu1 }
 0x23f   : > { %1554 = vst.msk [vmem:[%s2085_s22 + $0x70] sm:$0xff] %vm503_vm3, %v1538_v63  ;;  %v1536_v3 = vadd.f32 %v1752_v49, %v1484_v48  ;;  %v1487_v8 = vadd.f32 %v2548_v21, %v1464_v44  ;;  %v1462_v51 = vmul.f32 %v2542_v24, %v1430_v34 }
 0x241   : > { %1552 = vst.msk [vmem:[%s2085_s22 + $0x60] sm:$0xff] %vm503_vm3, %v1536_v3  ;;  %v1539_v42 = vadd.f32 %v1757_v15, %v1487_v8  ;;  %v1485_v61 = vadd.f32 %v2548_v21, %v1462_v51 }
 0x243   : > { %1555 = vst.msk [vmem:[%s2085_s22 + $0x78] sm:$0xff] %vm503_vm3, %v1539_v42  ;;  %v1537_v59 = vadd.f32 %v1753_v9, %v1485_v61 }
 0x245   : > { %1553 = vst.msk [vmem:[%s2085_s22 + $0x68] sm:$0xff] %vm503_vm3, %v1537_v59 }
 0x246 PF: > { %s20_s17 = sadd.s32 1, %s1924_s17   ;;  %s2648_s13 = smov %s1916_s15 }
 0x247   : > { %p17_p9 = scmp.ge.s32.totalorder %s20_s17, 6   ;;  %s2649_s14 = smov %s1920_s16 }
 0x248   : > { %s2650_s15 = smov %s2653_s18  ;;  %s2651_s16 = smov %s2657_s19 }
 0x249   :  { %19 = sbr.rel (!%p17_p9) target bundleno = 3 (0x3), region = 103 }

</bundles_post_ra>
